<compile_context>
chip_gen: v6e
topology: v6e:2x2x1
jax: 0.10.0
libtpu: 0.0.40
codegen_flags: <defaults>
</compile_context>

<pallas_src>
import jax
import jax.numpy as jnp
from jax.experimental import pallas as pl
from jax.experimental.pallas import tpu as pltpu


_OUT_LANES = 128  # lane-dense output / FC padding width


# ----------------------------------------------------------------------------
# One-time parameter packing: every weight/bias into a single (rows, 128) slab.
# ----------------------------------------------------------------------------
def pack_params(params):
    """Pack all weights/biases into one lane-dense f32 slab (done once).

    Returns (slab, layout) where layout[name] = (row_start, rows, cols) with
    row_start a multiple of 8 (sublane-aligned) so in-kernel static slices are
    cheap, well-formed loads.
    """
    h5, out_dim = params["fc_w"].shape
    fc_w_p = jnp.zeros((h5, _OUT_LANES), jnp.float32).at[:, :out_dim].set(
        params["fc_w"].astype(jnp.float32))
    fc_b_p = jnp.zeros((1, _OUT_LANES), jnp.float32).at[0, :out_dim].set(
        params["fc_b"].astype(jnp.float32))

    entries = [
        ("conv1_w", params["conv1_w"]),
        ("conv1_b", params["conv1_b"].reshape(1, -1)),
        ("lstm_w_ih", params["lstm_w_ih"]),
        ("lstm_w_hh", params["lstm_w_hh"]),
        ("lstm_b", params["lstm_b"].reshape(1, -1)),
        ("conv2_w", params["conv2_w"]),
        ("conv2_b", params["conv2_b"].reshape(1, -1)),
        ("conv3_w", params["conv3_w"]),
        ("conv3_b", params["conv3_b"].reshape(1, -1)),
        ("conv4_w", params["conv4_w"]),
        ("conv4_b", params["conv4_b"].reshape(1, -1)),
        ("conv5_w", params["conv5_w"]),
        ("conv5_b", params["conv5_b"].reshape(1, -1)),
        ("fc_w", fc_w_p),
        ("fc_b", fc_b_p),
    ]

    layout = {}
    blocks = []
    row = 0
    for name, arr in entries:
        arr = jnp.asarray(arr, jnp.float32)
        r, c = arr.shape
        r_pad = ((r + 7) // 8) * 8                       # sublane-align each block
        block = jnp.zeros((r_pad, _OUT_LANES), jnp.float32).at[:r, :c].set(arr)
        blocks.append(block)
        layout[name] = (row, r, c)
        row += r_pad
    slab = jnp.concatenate(blocks, axis=0)               # (rows, 128) ~112 KiB
    return slab, layout


# ----------------------------------------------------------------------------
# Fused kernel factory: GCN1 -> LSTM -> GCN2..5 -> FC -> sigmoid
# ----------------------------------------------------------------------------
def _make_kernel(layout, n, h1):
    def kernel(slab_ref, a_ref, x_ref, o_ref, xg_scr, h_all_scr):
        def w(name):
            r0, rows, cols = layout[name]                 # static Python ints
            return slab_ref[r0:r0 + rows, 0:cols]

        def gcn(x_in, wname, bname):
            # GCNConv: A_hat @ (X @ W) + b ;  A_hat re-read from VMEM each time
            xw = jnp.dot(x_in, w(wname), preferred_element_type=jnp.float32)
            return (jnp.dot(a_ref[...], xw, preferred_element_type=jnp.float32)
                    + w(bname))

        # --- conv1 + ReLU (dropout = identity in eval mode) ------------------
        x1 = jnp.maximum(gcn(x_ref[...], "conv1_w", "conv1_b"), 0.0)   # (N, H1)

        # --- LSTM (batch=1, sequence = N nodes), gates [i, f, g, o] ----------
        # Input projection + combined bias hoisted out of the serial loop and
        # staged in VMEM so each step is a cheap (1, 4H) row load.
        xg_scr[...] = (jnp.dot(x1, w("lstm_w_ih"),
                               preferred_element_type=jnp.float32)
                       + w("lstm_b"))                                   # (N, 4H)
        whh = w("lstm_w_hh")                                            # (H1, 4H1)

        # TODO(synk): on the serial chain, holding W_hh resident in the MXU via
        # pltpu.matmul_push_rhs / matmul_acc_lhs / matmul_pop (and MRB in-place
        # accumulate on v7x) could shave per-step latency; kept as jnp.dot for
        # portability.
        h = jnp.zeros((1, h1), jnp.float32)
        c = jnp.zeros((1, h1), jnp.float32)
        for t in range(n):                                # static, fully unrolled
            gates = xg_scr[t:t + 1, :] + jnp.dot(h, whh,
                                                 preferred_element_type=jnp.float32)
            sg = jax.nn.sigmoid(gates)                    # one EUP pass for i/f/o
            i_g = sg[:, 0 * h1:1 * h1]
            f_g = sg[:, 1 * h1:2 * h1]
            o_g = sg[:, 3 * h1:4 * h1]
            g_g = jnp.tanh(gates[:, 2 * h1:3 * h1])
            c = f_g * c + i_g * g_g
            h = o_g * jnp.tanh(c)
            h_all_scr[t:t + 1, :] = h
        x2 = h_all_scr[...]                                             # (N, H1)

        # --- conv2..conv5 + ReLU ---------------------------------------------
        x2 = jnp.maximum(gcn(x2, "conv2_w", "conv2_b"), 0.0)
        x3 = jnp.maximum(gcn(x2, "conv3_w", "conv3_b"), 0.0)
        x4 = jnp.maximum(gcn(x3, "conv4_w", "conv4_b"), 0.0)
        x5 = jnp.maximum(gcn(x4, "conv5_w", "conv5_b"), 0.0)

        # --- FC + sigmoid: lane-dense (N, 128) padded output ------------------
        y = jnp.dot(x5, w("fc_w"), preferred_element_type=jnp.float32) + w("fc_b")
        o_ref[...] = jax.nn.sigmoid(y).astype(o_ref.dtype)

    return kernel


def make_glstm4_forward(layout, n, h1):
    """Build the fused forward callable: (param_slab, a_hat, x) -> (N, 128)."""
    kernel = _make_kernel(layout, n, h1)
    call = pl.pallas_call(
        kernel,
        out_shape=jax.ShapeDtypeStruct((n, _OUT_LANES), jnp.float32),
        in_specs=[pl.BlockSpec(memory_space=pltpu.MemorySpace.VMEM)] * 3,
        out_specs=pl.BlockSpec(memory_space=pltpu.MemorySpace.VMEM),
        scratch_shapes=[
            pltpu.VMEM((n, 4 * h1), jnp.float32),   # staged LSTM input projection
            pltpu.VMEM((n, h1), jnp.float32),       # LSTM output sequence slab
        ],
    )

    def fwd(param_slab, a_hat, x):
        # Returns the lane-dense (N, 128) slab; caller slices to (N, out_dim).
        return call(param_slab, a_hat, x)

    return fwd


# ----------------------------------------------------------------------------
# Glue: GCN normalized adjacency, parameter init
# ----------------------------------------------------------------------------
def normalized_adjacency(edge_index, num_nodes):
    # A_hat = D^{-1/2} (A + I) D^{-1/2}; message flows src -> dst.
    # NOTE: matches PyG GCNConv for undirected/symmetric edge_index (dedups
    # multi-edges); directed multigraphs would diverge from PyTorch.
    src, dst = edge_index[0], edge_index[1]
    a = jnp.zeros((num_nodes, num_nodes), jnp.float32).at[dst, src].set(1.0)
    a = a + jnp.eye(num_nodes, dtype=jnp.float32)
    deg = a.sum(axis=1)
    d_inv_sqrt = 1.0 / jnp.sqrt(jnp.maximum(deg, 1e-12))
    return a * d_inv_sqrt[:, None] * d_inv_sqrt[None, :]


def init_params(key, input_dim, h1, h2, h3, h4, h5, out_dim):
    keys = jax.random.split(key, 16)
    s = 0.1
    p = {}
    dims = [(input_dim, h1), (h1, h2), (h2, h3), (h3, h4), (h4, h5)]
    for li, (fi, fo) in enumerate(dims, start=1):
        p[f"conv{li}_w"] = s * jax.random.normal(keys[2 * li - 2], (fi, fo), jnp.float32)
        p[f"conv{li}_b"] = s * jax.random.normal(keys[2 * li - 1], (fo,), jnp.float32)
    # LSTM: input_size = hidden_size = h1, stored pre-transposed as (H, 4H);
    # lstm_b is the PyTorch sum b_ih + b_hh (sum real weights when porting).
    p["lstm_w_ih"] = s * jax.random.normal(keys[10], (h1, 4 * h1), jnp.float32)
    p["lstm_w_hh"] = s * jax.random.normal(keys[11], (h1, 4 * h1), jnp.float32)
    p["lstm_b"] = s * jax.random.normal(keys[12], (4 * h1,), jnp.float32)
    p["fc_w"] = s * jax.random.normal(keys[13], (h5, out_dim), jnp.float32)
    p["fc_b"] = s * jax.random.normal(keys[14], (out_dim,), jnp.float32)
    return p


if __name__ == "__main__":
    # Small shapes: N=16 nodes, input_dim=8, hidden dims 32/16/16/16/16, out=4.
    N, INPUT_DIM = 16, 8
    H1, H2, H3, H4, H5, OUT = 32, 16, 16, 16, 16, 4

    key = jax.random.PRNGKey(0)
    k_x, k_p = jax.random.split(key)

    x = jax.random.normal(k_x, (N, INPUT_DIM), jnp.float32)

    # Simple deterministic ring graph (undirected -> both directions).
    src = jnp.arange(N, dtype=jnp.int32)
    dst = (src + 1) % N
    edge_index = jnp.stack([jnp.concatenate([src, dst]),
                            jnp.concatenate([dst, src])], axis=0)

    a_hat = normalized_adjacency(edge_index, N)
    params = init_params(k_p, INPUT_DIM, H1, H2, H3, H4, H5, OUT)

    # One-time packing of all weights into a single lane-dense VMEM slab.
    param_slab, layout = pack_params(params)
    param_slab = jax.block_until_ready(param_slab)

    fwd = jax.jit(make_glstm4_forward(layout, N, H1))
    out_padded = fwd(param_slab, a_hat, x)
    out_padded = jax.block_until_ready(out_padded)

    out = out_padded[:, :OUT]           # consumer-side slice of the padded slab
    assert out.shape == (N, OUT)
    assert bool(jnp.all(jnp.isfinite(out)))
    print("KERNEL_OK")
</pallas_src>

<mosaic_0001>
module attributes {stable_mosaic.version = 11 : i64} {
  func.func @kernel(%arg0: memref<224x128xf32, #tpu.memory_space<vmem>>, %arg1: memref<16x16xf32, #tpu.memory_space<vmem>>, %arg2: memref<16x8xf32, #tpu.memory_space<vmem>>, %arg3: memref<16x128xf32, #tpu.memory_space<vmem>>, %arg4: memref<16x128xf32, #tpu.memory_space<vmem>>, %arg5: memref<16x32xf32, #tpu.memory_space<vmem>>) attributes {dimension_semantics = [], scalar_prefetch = 0 : i64, scratch_operands = 2 : i64, tpu.core_type = #tpu.core_type<tc>} {
    %c0 = arith.constant 0 : index
    %c0_0 = arith.constant 0 : index
    %0 = vector.load %arg2[%c0, %c0_0] : memref<16x8xf32, #tpu.memory_space<vmem>>, vector<16x8xf32>
    %c0_1 = arith.constant 0 : index
    %c0_2 = arith.constant 0 : index
    %1 = vector.load %arg0[%c0_1, %c0_2] : memref<224x128xf32, #tpu.memory_space<vmem>>, vector<8x32xf32>
    %cst = arith.constant dense<0.000000e+00> : vector<16x32xf32>
    %2 = tpu.matmul %0, %1, %cst {dimension_numbers = #tpu.dot_dimension_numbers<[1], [0], [0], [1], [0, 0, 1, 1], [], []>} : vector<16x8xf32>, vector<8x32xf32>, vector<16x32xf32> -> vector<16x32xf32>
    %c0_3 = arith.constant 0 : index
    %c0_4 = arith.constant 0 : index
    %3 = vector.load %arg1[%c0_3, %c0_4] : memref<16x16xf32, #tpu.memory_space<vmem>>, vector<16x16xf32>
    %cst_5 = arith.constant dense<0.000000e+00> : vector<16x32xf32>
    %4 = tpu.matmul %3, %2, %cst_5 {dimension_numbers = #tpu.dot_dimension_numbers<[1], [0], [0], [1], [0, 0, 1, 1], [], []>} : vector<16x16xf32>, vector<16x32xf32>, vector<16x32xf32> -> vector<16x32xf32>
    %c8 = arith.constant 8 : index
    %c0_6 = arith.constant 0 : index
    %5 = vector.load %arg0[%c8, %c0_6] : memref<224x128xf32, #tpu.memory_space<vmem>>, vector<1x32xf32>
    %6 = vector.broadcast %5 : vector<1x32xf32> to vector<16x32xf32>
    %7 = arith.addf %4, %6 : vector<16x32xf32>
    %cst_7 = arith.constant 0.000000e+00 : f32
    %8 = vector.broadcast %cst_7 : f32 to vector<16x32xf32>
    %9 = arith.maximumf %7, %8 : vector<16x32xf32>
    %c16 = arith.constant 16 : index
    %c0_8 = arith.constant 0 : index
    %10 = vector.load %arg0[%c16, %c0_8] : memref<224x128xf32, #tpu.memory_space<vmem>>, vector<32x128xf32>
    %cst_9 = arith.constant dense<0.000000e+00> : vector<16x128xf32>
    %11 = tpu.matmul %9, %10, %cst_9 {dimension_numbers = #tpu.dot_dimension_numbers<[1], [0], [0], [1], [0, 0, 1, 1], [], []>} : vector<16x32xf32>, vector<32x128xf32>, vector<16x128xf32> -> vector<16x128xf32>
    %c80 = arith.constant 80 : index
    %c0_10 = arith.constant 0 : index
    %12 = vector.load %arg0[%c80, %c0_10] : memref<224x128xf32, #tpu.memory_space<vmem>>, vector<1x128xf32>
    %13 = vector.broadcast %12 : vector<1x128xf32> to vector<16x128xf32>
    %14 = arith.addf %11, %13 : vector<16x128xf32>
    %c0_11 = arith.constant 0 : index
    %c0_12 = arith.constant 0 : index
    %15 = vector.load %arg4[%c0_11, %c0_12] : memref<16x128xf32, #tpu.memory_space<vmem>>, vector<16x128xf32>
    tpu.vector_store %arg4[%c0_11, %c0_12], %14 {strides = array<i32>} : memref<16x128xf32, #tpu.memory_space<vmem>>, vector<16x128xf32>,
    %c48 = arith.constant 48 : index
    %c0_13 = arith.constant 0 : index
    %16 = vector.load %arg0[%c48, %c0_13] : memref<224x128xf32, #tpu.memory_space<vmem>>, vector<32x128xf32>
    %cst_14 = arith.constant 0.000000e+00 : f32
    %17 = vector.broadcast %cst_14 : f32 to vector<1x32xf32>
    %cst_15 = arith.constant 0.000000e+00 : f32
    %18 = vector.broadcast %cst_15 : f32 to vector<1x32xf32>
    %c0_16 = arith.constant 0 : index
    %c0_17 = arith.constant 0 : index
    %19 = vector.load %arg4[%c0_16, %c0_17] : memref<16x128xf32, #tpu.memory_space<vmem>>, vector<1x128xf32>
    %cst_18 = arith.constant dense<0.000000e+00> : vector<1x128xf32>
    %20 = tpu.matmul %17, %16, %cst_18 {dimension_numbers = #tpu.dot_dimension_numbers<[1], [0], [0], [1], [0, 0, 1, 1], [], []>} : vector<1x32xf32>, vector<32x128xf32>, vector<1x128xf32> -> vector<1x128xf32>
    %21 = arith.addf %19, %20 : vector<1x128xf32>
    %22 = arith.negf %21 : vector<1x128xf32>
    %23 = math.exp %22 : vector<1x128xf32>
    %cst_19 = arith.constant 1.000000e+00 : f32
    %24 = vector.broadcast %cst_19 : f32 to vector<1x128xf32>
    %25 = arith.addf %24, %23 : vector<1x128xf32>
    %26 = arith.divf %24, %25 : vector<1x128xf32>
    %27 = vector.extract_strided_slice %26 {offsets = [0, 0], sizes = [1, 32], strides = [1, 1]} : vector<1x128xf32> to vector<1x32xf32>
    %28 = vector.extract_strided_slice %26 {offsets = [0, 32], sizes = [1, 32], strides = [1, 1]} : vector<1x128xf32> to vector<1x32xf32>
    %29 = vector.extract_strided_slice %26 {offsets = [0, 96], sizes = [1, 32], strides = [1, 1]} : vector<1x128xf32> to vector<1x32xf32>
    %30 = vector.extract_strided_slice %21 {offsets = [0, 64], sizes = [1, 32], strides = [1, 1]} : vector<1x128xf32> to vector<1x32xf32>
    %31 = math.tanh %30 : vector<1x32xf32>
    %32 = arith.mulf %28, %18 : vector<1x32xf32>
    %33 = arith.mulf %27, %31 : vector<1x32xf32>
    %34 = arith.addf %32, %33 : vector<1x32xf32>
    %35 = math.tanh %34 : vector<1x32xf32>
    %36 = arith.mulf %29, %35 : vector<1x32xf32>
    %c0_20 = arith.constant 0 : index
    %c0_21 = arith.constant 0 : index
    %37 = vector.load %arg5[%c0_20, %c0_21] : memref<16x32xf32, #tpu.memory_space<vmem>>, vector<1x32xf32>
    tpu.vector_store %arg5[%c0_20, %c0_21], %36 {strides = array<i32>} : memref<16x32xf32, #tpu.memory_space<vmem>>, vector<1x32xf32>,
    %c1 = arith.constant 1 : index
    %c0_22 = arith.constant 0 : index
    %38 = vector.load %arg4[%c1, %c0_22] : memref<16x128xf32, #tpu.memory_space<vmem>>, vector<1x128xf32>
    %cst_23 = arith.constant dense<0.000000e+00> : vector<1x128xf32>
    %39 = tpu.matmul %36, %16, %cst_23 {dimension_numbers = #tpu.dot_dimension_numbers<[1], [0], [0], [1], [0, 0, 1, 1], [], []>} : vector<1x32xf32>, vector<32x128xf32>, vector<1x128xf32> -> vector<1x128xf32>
    %40 = arith.addf %38, %39 : vector<1x128xf32>
    %41 = arith.negf %40 : vector<1x128xf32>
    %42 = math.exp %41 : vector<1x128xf32>
    %cst_24 = arith.constant 1.000000e+00 : f32
    %43 = vector.broadcast %cst_24 : f32 to vector<1x128xf32>
    %44 = arith.addf %43, %42 : vector<1x128xf32>
    %45 = arith.divf %43, %44 : vector<1x128xf32>
    %46 = vector.extract_strided_slice %45 {offsets = [0, 0], sizes = [1, 32], strides = [1, 1]} : vector<1x128xf32> to vector<1x32xf32>
    %47 = vector.extract_strided_slice %45 {offsets = [0, 32], sizes = [1, 32], strides = [1, 1]} : vector<1x128xf32> to vector<1x32xf32>
    %48 = vector.extract_strided_slice %45 {offsets = [0, 96], sizes = [1, 32], strides = [1, 1]} : vector<1x128xf32> to vector<1x32xf32>
    %49 = vector.extract_strided_slice %40 {offsets = [0, 64], sizes = [1, 32], strides = [1, 1]} : vector<1x128xf32> to vector<1x32xf32>
    %50 = math.tanh %49 : vector<1x32xf32>
    %51 = arith.mulf %47, %34 : vector<1x32xf32>
    %52 = arith.mulf %46, %50 : vector<1x32xf32>
    %53 = arith.addf %51, %52 : vector<1x32xf32>
    %54 = math.tanh %53 : vector<1x32xf32>
    %55 = arith.mulf %48, %54 : vector<1x32xf32>
    %c1_25 = arith.constant 1 : index
    %c0_26 = arith.constant 0 : index
    %56 = vector.load %arg5[%c1_25, %c0_26] : memref<16x32xf32, #tpu.memory_space<vmem>>, vector<1x32xf32>
    tpu.vector_store %arg5[%c1_25, %c0_26], %55 {strides = array<i32>} : memref<16x32xf32, #tpu.memory_space<vmem>>, vector<1x32xf32>,
    %c2 = arith.constant 2 : index
    %c0_27 = arith.constant 0 : index
    %57 = vector.load %arg4[%c2, %c0_27] : memref<16x128xf32, #tpu.memory_space<vmem>>, vector<1x128xf32>
    %cst_28 = arith.constant dense<0.000000e+00> : vector<1x128xf32>
    %58 = tpu.matmul %55, %16, %cst_28 {dimension_numbers = #tpu.dot_dimension_numbers<[1], [0], [0], [1], [0, 0, 1, 1], [], []>} : vector<1x32xf32>, vector<32x128xf32>, vector<1x128xf32> -> vector<1x128xf32>
    %59 = arith.addf %57, %58 : vector<1x128xf32>
    %60 = arith.negf %59 : vector<1x128xf32>
    %61 = math.exp %60 : vector<1x128xf32>
    %cst_29 = arith.constant 1.000000e+00 : f32
    %62 = vector.broadcast %cst_29 : f32 to vector<1x128xf32>
    %63 = arith.addf %62, %61 : vector<1x128xf32>
    %64 = arith.divf %62, %63 : vector<1x128xf32>
    %65 = vector.extract_strided_slice %64 {offsets = [0, 0], sizes = [1, 32], strides = [1, 1]} : vector<1x128xf32> to vector<1x32xf32>
    %66 = vector.extract_strided_slice %64 {offsets = [0, 32], sizes = [1, 32], strides = [1, 1]} : vector<1x128xf32> to vector<1x32xf32>
    %67 = vector.extract_strided_slice %64 {offsets = [0, 96], sizes = [1, 32], strides = [1, 1]} : vector<1x128xf32> to vector<1x32xf32>
    %68 = vector.extract_strided_slice %59 {offsets = [0, 64], sizes = [1, 32], strides = [1, 1]} : vector<1x128xf32> to vector<1x32xf32>
    %69 = math.tanh %68 : vector<1x32xf32>
    %70 = arith.mulf %66, %53 : vector<1x32xf32>
    %71 = arith.mulf %65, %69 : vector<1x32xf32>
    %72 = arith.addf %70, %71 : vector<1x32xf32>
    %73 = math.tanh %72 : vector<1x32xf32>
    %74 = arith.mulf %67, %73 : vector<1x32xf32>
    %c2_30 = arith.constant 2 : index
    %c0_31 = arith.constant 0 : index
    %75 = vector.load %arg5[%c2_30, %c0_31] : memref<16x32xf32, #tpu.memory_space<vmem>>, vector<1x32xf32>
    tpu.vector_store %arg5[%c2_30, %c0_31], %74 {strides = array<i32>} : memref<16x32xf32, #tpu.memory_space<vmem>>, vector<1x32xf32>,
    %c3 = arith.constant 3 : index
    %c0_32 = arith.constant 0 : index
    %76 = vector.load %arg4[%c3, %c0_32] : memref<16x128xf32, #tpu.memory_space<vmem>>, vector<1x128xf32>
    %cst_33 = arith.constant dense<0.000000e+00> : vector<1x128xf32>
    %77 = tpu.matmul %74, %16, %cst_33 {dimension_numbers = #tpu.dot_dimension_numbers<[1], [0], [0], [1], [0, 0, 1, 1], [], []>} : vector<1x32xf32>, vector<32x128xf32>, vector<1x128xf32> -> vector<1x128xf32>
    %78 = arith.addf %76, %77 : vector<1x128xf32>
    %79 = arith.negf %78 : vector<1x128xf32>
    %80 = math.exp %79 : vector<1x128xf32>
    %cst_34 = arith.constant 1.000000e+00 : f32
    %81 = vector.broadcast %cst_34 : f32 to vector<1x128xf32>
    %82 = arith.addf %81, %80 : vector<1x128xf32>
    %83 = arith.divf %81, %82 : vector<1x128xf32>
    %84 = vector.extract_strided_slice %83 {offsets = [0, 0], sizes = [1, 32], strides = [1, 1]} : vector<1x128xf32> to vector<1x32xf32>
    %85 = vector.extract_strided_slice %83 {offsets = [0, 32], sizes = [1, 32], strides = [1, 1]} : vector<1x128xf32> to vector<1x32xf32>
    %86 = vector.extract_strided_slice %83 {offsets = [0, 96], sizes = [1, 32], strides = [1, 1]} : vector<1x128xf32> to vector<1x32xf32>
    %87 = vector.extract_strided_slice %78 {offsets = [0, 64], sizes = [1, 32], strides = [1, 1]} : vector<1x128xf32> to vector<1x32xf32>
    %88 = math.tanh %87 : vector<1x32xf32>
    %89 = arith.mulf %85, %72 : vector<1x32xf32>
    %90 = arith.mulf %84, %88 : vector<1x32xf32>
    %91 = arith.addf %89, %90 : vector<1x32xf32>
    %92 = math.tanh %91 : vector<1x32xf32>
    %93 = arith.mulf %86, %92 : vector<1x32xf32>
    %c3_35 = arith.constant 3 : index
    %c0_36 = arith.constant 0 : index
    %94 = vector.load %arg5[%c3_35, %c0_36] : memref<16x32xf32, #tpu.memory_space<vmem>>, vector<1x32xf32>
    tpu.vector_store %arg5[%c3_35, %c0_36], %93 {strides = array<i32>} : memref<16x32xf32, #tpu.memory_space<vmem>>, vector<1x32xf32>,
    %c4 = arith.constant 4 : index
    %c0_37 = arith.constant 0 : index
    %95 = vector.load %arg4[%c4, %c0_37] : memref<16x128xf32, #tpu.memory_space<vmem>>, vector<1x128xf32>
    %cst_38 = arith.constant dense<0.000000e+00> : vector<1x128xf32>
    %96 = tpu.matmul %93, %16, %cst_38 {dimension_numbers = #tpu.dot_dimension_numbers<[1], [0], [0], [1], [0, 0, 1, 1], [], []>} : vector<1x32xf32>, vector<32x128xf32>, vector<1x128xf32> -> vector<1x128xf32>
    %97 = arith.addf %95, %96 : vector<1x128xf32>
    %98 = arith.negf %97 : vector<1x128xf32>
    %99 = math.exp %98 : vector<1x128xf32>
    %cst_39 = arith.constant 1.000000e+00 : f32
    %100 = vector.broadcast %cst_39 : f32 to vector<1x128xf32>
    %101 = arith.addf %100, %99 : vector<1x128xf32>
    %102 = arith.divf %100, %101 : vector<1x128xf32>
    %103 = vector.extract_strided_slice %102 {offsets = [0, 0], sizes = [1, 32], strides = [1, 1]} : vector<1x128xf32> to vector<1x32xf32>
    %104 = vector.extract_strided_slice %102 {offsets = [0, 32], sizes = [1, 32], strides = [1, 1]} : vector<1x128xf32> to vector<1x32xf32>
    %105 = vector.extract_strided_slice %102 {offsets = [0, 96], sizes = [1, 32], strides = [1, 1]} : vector<1x128xf32> to vector<1x32xf32>
    %106 = vector.extract_strided_slice %97 {offsets = [0, 64], sizes = [1, 32], strides = [1, 1]} : vector<1x128xf32> to vector<1x32xf32>
    %107 = math.tanh %106 : vector<1x32xf32>
    %108 = arith.mulf %104, %91 : vector<1x32xf32>
    %109 = arith.mulf %103, %107 : vector<1x32xf32>
    %110 = arith.addf %108, %109 : vector<1x32xf32>
    %111 = math.tanh %110 : vector<1x32xf32>
    %112 = arith.mulf %105, %111 : vector<1x32xf32>
    %c4_40 = arith.constant 4 : index
    %c0_41 = arith.constant 0 : index
    %113 = vector.load %arg5[%c4_40, %c0_41] : memref<16x32xf32, #tpu.memory_space<vmem>>, vector<1x32xf32>
    tpu.vector_store %arg5[%c4_40, %c0_41], %112 {strides = array<i32>} : memref<16x32xf32, #tpu.memory_space<vmem>>, vector<1x32xf32>,
    %c5 = arith.constant 5 : index
    %c0_42 = arith.constant 0 : index
    %114 = vector.load %arg4[%c5, %c0_42] : memref<16x128xf32, #tpu.memory_space<vmem>>, vector<1x128xf32>
    %cst_43 = arith.constant dense<0.000000e+00> : vector<1x128xf32>
    %115 = tpu.matmul %112, %16, %cst_43 {dimension_numbers = #tpu.dot_dimension_numbers<[1], [0], [0], [1], [0, 0, 1, 1], [], []>} : vector<1x32xf32>, vector<32x128xf32>, vector<1x128xf32> -> vector<1x128xf32>
    %116 = arith.addf %114, %115 : vector<1x128xf32>
    %117 = arith.negf %116 : vector<1x128xf32>
    %118 = math.exp %117 : vector<1x128xf32>
    %cst_44 = arith.constant 1.000000e+00 : f32
    %119 = vector.broadcast %cst_44 : f32 to vector<1x128xf32>
    %120 = arith.addf %119, %118 : vector<1x128xf32>
    %121 = arith.divf %119, %120 : vector<1x128xf32>
    %122 = vector.extract_strided_slice %121 {offsets = [0, 0], sizes = [1, 32], strides = [1, 1]} : vector<1x128xf32> to vector<1x32xf32>
    %123 = vector.extract_strided_slice %121 {offsets = [0, 32], sizes = [1, 32], strides = [1, 1]} : vector<1x128xf32> to vector<1x32xf32>
    %124 = vector.extract_strided_slice %121 {offsets = [0, 96], sizes = [1, 32], strides = [1, 1]} : vector<1x128xf32> to vector<1x32xf32>
    %125 = vector.extract_strided_slice %116 {offsets = [0, 64], sizes = [1, 32], strides = [1, 1]} : vector<1x128xf32> to vector<1x32xf32>
    %126 = math.tanh %125 : vector<1x32xf32>
    %127 = arith.mulf %123, %110 : vector<1x32xf32>
    %128 = arith.mulf %122, %126 : vector<1x32xf32>
    %129 = arith.addf %127, %128 : vector<1x32xf32>
    %130 = math.tanh %129 : vector<1x32xf32>
    %131 = arith.mulf %124, %130 : vector<1x32xf32>
    %c5_45 = arith.constant 5 : index
    %c0_46 = arith.constant 0 : index
    %132 = vector.load %arg5[%c5_45, %c0_46] : memref<16x32xf32, #tpu.memory_space<vmem>>, vector<1x32xf32>
    tpu.vector_store %arg5[%c5_45, %c0_46], %131 {strides = array<i32>} : memref<16x32xf32, #tpu.memory_space<vmem>>, vector<1x32xf32>,
    %c6 = arith.constant 6 : index
    %c0_47 = arith.constant 0 : index
    %133 = vector.load %arg4[%c6, %c0_47] : memref<16x128xf32, #tpu.memory_space<vmem>>, vector<1x128xf32>
    %cst_48 = arith.constant dense<0.000000e+00> : vector<1x128xf32>
    %134 = tpu.matmul %131, %16, %cst_48 {dimension_numbers = #tpu.dot_dimension_numbers<[1], [0], [0], [1], [0, 0, 1, 1], [], []>} : vector<1x32xf32>, vector<32x128xf32>, vector<1x128xf32> -> vector<1x128xf32>
    %135 = arith.addf %133, %134 : vector<1x128xf32>
    %136 = arith.negf %135 : vector<1x128xf32>
    %137 = math.exp %136 : vector<1x128xf32>
    %cst_49 = arith.constant 1.000000e+00 : f32
    %138 = vector.broadcast %cst_49 : f32 to vector<1x128xf32>
    %139 = arith.addf %138, %137 : vector<1x128xf32>
    %140 = arith.divf %138, %139 : vector<1x128xf32>
    %141 = vector.extract_strided_slice %140 {offsets = [0, 0], sizes = [1, 32], strides = [1, 1]} : vector<1x128xf32> to vector<1x32xf32>
    %142 = vector.extract_strided_slice %140 {offsets = [0, 32], sizes = [1, 32], strides = [1, 1]} : vector<1x128xf32> to vector<1x32xf32>
    %143 = vector.extract_strided_slice %140 {offsets = [0, 96], sizes = [1, 32], strides = [1, 1]} : vector<1x128xf32> to vector<1x32xf32>
    %144 = vector.extract_strided_slice %135 {offsets = [0, 64], sizes = [1, 32], strides = [1, 1]} : vector<1x128xf32> to vector<1x32xf32>
    %145 = math.tanh %144 : vector<1x32xf32>
    %146 = arith.mulf %142, %129 : vector<1x32xf32>
    %147 = arith.mulf %141, %145 : vector<1x32xf32>
    %148 = arith.addf %146, %147 : vector<1x32xf32>
    %149 = math.tanh %148 : vector<1x32xf32>
    %150 = arith.mulf %143, %149 : vector<1x32xf32>
    %c6_50 = arith.constant 6 : index
    %c0_51 = arith.constant 0 : index
    %151 = vector.load %arg5[%c6_50, %c0_51] : memref<16x32xf32, #tpu.memory_space<vmem>>, vector<1x32xf32>
    tpu.vector_store %arg5[%c6_50, %c0_51], %150 {strides = array<i32>} : memref<16x32xf32, #tpu.memory_space<vmem>>, vector<1x32xf32>,
    %c7 = arith.constant 7 : index
    %c0_52 = arith.constant 0 : index
    %152 = vector.load %arg4[%c7, %c0_52] : memref<16x128xf32, #tpu.memory_space<vmem>>, vector<1x128xf32>
    %cst_53 = arith.constant dense<0.000000e+00> : vector<1x128xf32>
    %153 = tpu.matmul %150, %16, %cst_53 {dimension_numbers = #tpu.dot_dimension_numbers<[1], [0], [0], [1], [0, 0, 1, 1], [], []>} : vector<1x32xf32>, vector<32x128xf32>, vector<1x128xf32> -> vector<1x128xf32>
    %154 = arith.addf %152, %153 : vector<1x128xf32>
    %155 = arith.negf %154 : vector<1x128xf32>
    %156 = math.exp %155 : vector<1x128xf32>
    %cst_54 = arith.constant 1.000000e+00 : f32
    %157 = vector.broadcast %cst_54 : f32 to vector<1x128xf32>
    %158 = arith.addf %157, %156 : vector<1x128xf32>
    %159 = arith.divf %157, %158 : vector<1x128xf32>
    %160 = vector.extract_strided_slice %159 {offsets = [0, 0], sizes = [1, 32], strides = [1, 1]} : vector<1x128xf32> to vector<1x32xf32>
    %161 = vector.extract_strided_slice %159 {offsets = [0, 32], sizes = [1, 32], strides = [1, 1]} : vector<1x128xf32> to vector<1x32xf32>
    %162 = vector.extract_strided_slice %159 {offsets = [0, 96], sizes = [1, 32], strides = [1, 1]} : vector<1x128xf32> to vector<1x32xf32>
    %163 = vector.extract_strided_slice %154 {offsets = [0, 64], sizes = [1, 32], strides = [1, 1]} : vector<1x128xf32> to vector<1x32xf32>
    %164 = math.tanh %163 : vector<1x32xf32>
    %165 = arith.mulf %161, %148 : vector<1x32xf32>
    %166 = arith.mulf %160, %164 : vector<1x32xf32>
    %167 = arith.addf %165, %166 : vector<1x32xf32>
    %168 = math.tanh %167 : vector<1x32xf32>
    %169 = arith.mulf %162, %168 : vector<1x32xf32>
    %c7_55 = arith.constant 7 : index
    %c0_56 = arith.constant 0 : index
    %170 = vector.load %arg5[%c7_55, %c0_56] : memref<16x32xf32, #tpu.memory_space<vmem>>, vector<1x32xf32>
    tpu.vector_store %arg5[%c7_55, %c0_56], %169 {strides = array<i32>} : memref<16x32xf32, #tpu.memory_space<vmem>>, vector<1x32xf32>,
    %c8_57 = arith.constant 8 : index
    %c0_58 = arith.constant 0 : index
    %171 = vector.load %arg4[%c8_57, %c0_58] : memref<16x128xf32, #tpu.memory_space<vmem>>, vector<1x128xf32>
    %cst_59 = arith.constant dense<0.000000e+00> : vector<1x128xf32>
    %172 = tpu.matmul %169, %16, %cst_59 {dimension_numbers = #tpu.dot_dimension_numbers<[1], [0], [0], [1], [0, 0, 1, 1], [], []>} : vector<1x32xf32>, vector<32x128xf32>, vector<1x128xf32> -> vector<1x128xf32>
    %173 = arith.addf %171, %172 : vector<1x128xf32>
    %174 = arith.negf %173 : vector<1x128xf32>
    %175 = math.exp %174 : vector<1x128xf32>
    %cst_60 = arith.constant 1.000000e+00 : f32
    %176 = vector.broadcast %cst_60 : f32 to vector<1x128xf32>
    %177 = arith.addf %176, %175 : vector<1x128xf32>
    %178 = arith.divf %176, %177 : vector<1x128xf32>
    %179 = vector.extract_strided_slice %178 {offsets = [0, 0], sizes = [1, 32], strides = [1, 1]} : vector<1x128xf32> to vector<1x32xf32>
    %180 = vector.extract_strided_slice %178 {offsets = [0, 32], sizes = [1, 32], strides = [1, 1]} : vector<1x128xf32> to vector<1x32xf32>
    %181 = vector.extract_strided_slice %178 {offsets = [0, 96], sizes = [1, 32], strides = [1, 1]} : vector<1x128xf32> to vector<1x32xf32>
    %182 = vector.extract_strided_slice %173 {offsets = [0, 64], sizes = [1, 32], strides = [1, 1]} : vector<1x128xf32> to vector<1x32xf32>
    %183 = math.tanh %182 : vector<1x32xf32>
    %184 = arith.mulf %180, %167 : vector<1x32xf32>
    %185 = arith.mulf %179, %183 : vector<1x32xf32>
    %186 = arith.addf %184, %185 : vector<1x32xf32>
    %187 = math.tanh %186 : vector<1x32xf32>
    %188 = arith.mulf %181, %187 : vector<1x32xf32>
    %c8_61 = arith.constant 8 : index
    %c0_62 = arith.constant 0 : index
    %189 = vector.load %arg5[%c8_61, %c0_62] : memref<16x32xf32, #tpu.memory_space<vmem>>, vector<1x32xf32>
    tpu.vector_store %arg5[%c8_61, %c0_62], %188 {strides = array<i32>} : memref<16x32xf32, #tpu.memory_space<vmem>>, vector<1x32xf32>,
    %c9 = arith.constant 9 : index
    %c0_63 = arith.constant 0 : index
    %190 = vector.load %arg4[%c9, %c0_63] : memref<16x128xf32, #tpu.memory_space<vmem>>, vector<1x128xf32>
    %cst_64 = arith.constant dense<0.000000e+00> : vector<1x128xf32>
    %191 = tpu.matmul %188, %16, %cst_64 {dimension_numbers = #tpu.dot_dimension_numbers<[1], [0], [0], [1], [0, 0, 1, 1], [], []>} : vector<1x32xf32>, vector<32x128xf32>, vector<1x128xf32> -> vector<1x128xf32>
    %192 = arith.addf %190, %191 : vector<1x128xf32>
    %193 = arith.negf %192 : vector<1x128xf32>
    %194 = math.exp %193 : vector<1x128xf32>
    %cst_65 = arith.constant 1.000000e+00 : f32
    %195 = vector.broadcast %cst_65 : f32 to vector<1x128xf32>
    %196 = arith.addf %195, %194 : vector<1x128xf32>
    %197 = arith.divf %195, %196 : vector<1x128xf32>
    %198 = vector.extract_strided_slice %197 {offsets = [0, 0], sizes = [1, 32], strides = [1, 1]} : vector<1x128xf32> to vector<1x32xf32>
    %199 = vector.extract_strided_slice %197 {offsets = [0, 32], sizes = [1, 32], strides = [1, 1]} : vector<1x128xf32> to vector<1x32xf32>
    %200 = vector.extract_strided_slice %197 {offsets = [0, 96], sizes = [1, 32], strides = [1, 1]} : vector<1x128xf32> to vector<1x32xf32>
    %201 = vector.extract_strided_slice %192 {offsets = [0, 64], sizes = [1, 32], strides = [1, 1]} : vector<1x128xf32> to vector<1x32xf32>
    %202 = math.tanh %201 : vector<1x32xf32>
    %203 = arith.mulf %199, %186 : vector<1x32xf32>
    %204 = arith.mulf %198, %202 : vector<1x32xf32>
    %205 = arith.addf %203, %204 : vector<1x32xf32>
    %206 = math.tanh %205 : vector<1x32xf32>
    %207 = arith.mulf %200, %206 : vector<1x32xf32>
    %c9_66 = arith.constant 9 : index
    %c0_67 = arith.constant 0 : index
    %208 = vector.load %arg5[%c9_66, %c0_67] : memref<16x32xf32, #tpu.memory_space<vmem>>, vector<1x32xf32>
    tpu.vector_store %arg5[%c9_66, %c0_67], %207 {strides = array<i32>} : memref<16x32xf32, #tpu.memory_space<vmem>>, vector<1x32xf32>,
    %c10 = arith.constant 10 : index
    %c0_68 = arith.constant 0 : index
    %209 = vector.load %arg4[%c10, %c0_68] : memref<16x128xf32, #tpu.memory_space<vmem>>, vector<1x128xf32>
    %cst_69 = arith.constant dense<0.000000e+00> : vector<1x128xf32>
    %210 = tpu.matmul %207, %16, %cst_69 {dimension_numbers = #tpu.dot_dimension_numbers<[1], [0], [0], [1], [0, 0, 1, 1], [], []>} : vector<1x32xf32>, vector<32x128xf32>, vector<1x128xf32> -> vector<1x128xf32>
    %211 = arith.addf %209, %210 : vector<1x128xf32>
    %212 = arith.negf %211 : vector<1x128xf32>
    %213 = math.exp %212 : vector<1x128xf32>
    %cst_70 = arith.constant 1.000000e+00 : f32
    %214 = vector.broadcast %cst_70 : f32 to vector<1x128xf32>
    %215 = arith.addf %214, %213 : vector<1x128xf32>
    %216 = arith.divf %214, %215 : vector<1x128xf32>
    %217 = vector.extract_strided_slice %216 {offsets = [0, 0], sizes = [1, 32], strides = [1, 1]} : vector<1x128xf32> to vector<1x32xf32>
    %218 = vector.extract_strided_slice %216 {offsets = [0, 32], sizes = [1, 32], strides = [1, 1]} : vector<1x128xf32> to vector<1x32xf32>
    %219 = vector.extract_strided_slice %216 {offsets = [0, 96], sizes = [1, 32], strides = [1, 1]} : vector<1x128xf32> to vector<1x32xf32>
    %220 = vector.extract_strided_slice %211 {offsets = [0, 64], sizes = [1, 32], strides = [1, 1]} : vector<1x128xf32> to vector<1x32xf32>
    %221 = math.tanh %220 : vector<1x32xf32>
    %222 = arith.mulf %218, %205 : vector<1x32xf32>
    %223 = arith.mulf %217, %221 : vector<1x32xf32>
    %224 = arith.addf %222, %223 : vector<1x32xf32>
    %225 = math.tanh %224 : vector<1x32xf32>
    %226 = arith.mulf %219, %225 : vector<1x32xf32>
    %c10_71 = arith.constant 10 : index
    %c0_72 = arith.constant 0 : index
    %227 = vector.load %arg5[%c10_71, %c0_72] : memref<16x32xf32, #tpu.memory_space<vmem>>, vector<1x32xf32>
    tpu.vector_store %arg5[%c10_71, %c0_72], %226 {strides = array<i32>} : memref<16x32xf32, #tpu.memory_space<vmem>>, vector<1x32xf32>,
    %c11 = arith.constant 11 : index
    %c0_73 = arith.constant 0 : index
    %228 = vector.load %arg4[%c11, %c0_73] : memref<16x128xf32, #tpu.memory_space<vmem>>, vector<1x128xf32>
    %cst_74 = arith.constant dense<0.000000e+00> : vector<1x128xf32>
    %229 = tpu.matmul %226, %16, %cst_74 {dimension_numbers = #tpu.dot_dimension_numbers<[1], [0], [0], [1], [0, 0, 1, 1], [], []>} : vector<1x32xf32>, vector<32x128xf32>, vector<1x128xf32> -> vector<1x128xf32>
    %230 = arith.addf %228, %229 : vector<1x128xf32>
    %231 = arith.negf %230 : vector<1x128xf32>
    %232 = math.exp %231 : vector<1x128xf32>
    %cst_75 = arith.constant 1.000000e+00 : f32
    %233 = vector.broadcast %cst_75 : f32 to vector<1x128xf32>
    %234 = arith.addf %233, %232 : vector<1x128xf32>
    %235 = arith.divf %233, %234 : vector<1x128xf32>
    %236 = vector.extract_strided_slice %235 {offsets = [0, 0], sizes = [1, 32], strides = [1, 1]} : vector<1x128xf32> to vector<1x32xf32>
    %237 = vector.extract_strided_slice %235 {offsets = [0, 32], sizes = [1, 32], strides = [1, 1]} : vector<1x128xf32> to vector<1x32xf32>
    %238 = vector.extract_strided_slice %235 {offsets = [0, 96], sizes = [1, 32], strides = [1, 1]} : vector<1x128xf32> to vector<1x32xf32>
    %239 = vector.extract_strided_slice %230 {offsets = [0, 64], sizes = [1, 32], strides = [1, 1]} : vector<1x128xf32> to vector<1x32xf32>
    %240 = math.tanh %239 : vector<1x32xf32>
    %241 = arith.mulf %237, %224 : vector<1x32xf32>
    %242 = arith.mulf %236, %240 : vector<1x32xf32>
    %243 = arith.addf %241, %242 : vector<1x32xf32>
    %244 = math.tanh %243 : vector<1x32xf32>
    %245 = arith.mulf %238, %244 : vector<1x32xf32>
    %c11_76 = arith.constant 11 : index
    %c0_77 = arith.constant 0 : index
    %246 = vector.load %arg5[%c11_76, %c0_77] : memref<16x32xf32, #tpu.memory_space<vmem>>, vector<1x32xf32>
    tpu.vector_store %arg5[%c11_76, %c0_77], %245 {strides = array<i32>} : memref<16x32xf32, #tpu.memory_space<vmem>>, vector<1x32xf32>,
    %c12 = arith.constant 12 : index
    %c0_78 = arith.constant 0 : index
    %247 = vector.load %arg4[%c12, %c0_78] : memref<16x128xf32, #tpu.memory_space<vmem>>, vector<1x128xf32>
    %cst_79 = arith.constant dense<0.000000e+00> : vector<1x128xf32>
    %248 = tpu.matmul %245, %16, %cst_79 {dimension_numbers = #tpu.dot_dimension_numbers<[1], [0], [0], [1], [0, 0, 1, 1], [], []>} : vector<1x32xf32>, vector<32x128xf32>, vector<1x128xf32> -> vector<1x128xf32>
    %249 = arith.addf %247, %248 : vector<1x128xf32>
    %250 = arith.negf %249 : vector<1x128xf32>
    %251 = math.exp %250 : vector<1x128xf32>
    %cst_80 = arith.constant 1.000000e+00 : f32
    %252 = vector.broadcast %cst_80 : f32 to vector<1x128xf32>
    %253 = arith.addf %252, %251 : vector<1x128xf32>
    %254 = arith.divf %252, %253 : vector<1x128xf32>
    %255 = vector.extract_strided_slice %254 {offsets = [0, 0], sizes = [1, 32], strides = [1, 1]} : vector<1x128xf32> to vector<1x32xf32>
    %256 = vector.extract_strided_slice %254 {offsets = [0, 32], sizes = [1, 32], strides = [1, 1]} : vector<1x128xf32> to vector<1x32xf32>
    %257 = vector.extract_strided_slice %254 {offsets = [0, 96], sizes = [1, 32], strides = [1, 1]} : vector<1x128xf32> to vector<1x32xf32>
    %258 = vector.extract_strided_slice %249 {offsets = [0, 64], sizes = [1, 32], strides = [1, 1]} : vector<1x128xf32> to vector<1x32xf32>
    %259 = math.tanh %258 : vector<1x32xf32>
    %260 = arith.mulf %256, %243 : vector<1x32xf32>
    %261 = arith.mulf %255, %259 : vector<1x32xf32>
    %262 = arith.addf %260, %261 : vector<1x32xf32>
    %263 = math.tanh %262 : vector<1x32xf32>
    %264 = arith.mulf %257, %263 : vector<1x32xf32>
    %c12_81 = arith.constant 12 : index
    %c0_82 = arith.constant 0 : index
    %265 = vector.load %arg5[%c12_81, %c0_82] : memref<16x32xf32, #tpu.memory_space<vmem>>, vector<1x32xf32>
    tpu.vector_store %arg5[%c12_81, %c0_82], %264 {strides = array<i32>} : memref<16x32xf32, #tpu.memory_space<vmem>>, vector<1x32xf32>,
    %c13 = arith.constant 13 : index
    %c0_83 = arith.constant 0 : index
    %266 = vector.load %arg4[%c13, %c0_83] : memref<16x128xf32, #tpu.memory_space<vmem>>, vector<1x128xf32>
    %cst_84 = arith.constant dense<0.000000e+00> : vector<1x128xf32>
    %267 = tpu.matmul %264, %16, %cst_84 {dimension_numbers = #tpu.dot_dimension_numbers<[1], [0], [0], [1], [0, 0, 1, 1], [], []>} : vector<1x32xf32>, vector<32x128xf32>, vector<1x128xf32> -> vector<1x128xf32>
    %268 = arith.addf %266, %267 : vector<1x128xf32>
    %269 = arith.negf %268 : vector<1x128xf32>
    %270 = math.exp %269 : vector<1x128xf32>
    %cst_85 = arith.constant 1.000000e+00 : f32
    %271 = vector.broadcast %cst_85 : f32 to vector<1x128xf32>
    %272 = arith.addf %271, %270 : vector<1x128xf32>
    %273 = arith.divf %271, %272 : vector<1x128xf32>
    %274 = vector.extract_strided_slice %273 {offsets = [0, 0], sizes = [1, 32], strides = [1, 1]} : vector<1x128xf32> to vector<1x32xf32>
    %275 = vector.extract_strided_slice %273 {offsets = [0, 32], sizes = [1, 32], strides = [1, 1]} : vector<1x128xf32> to vector<1x32xf32>
    %276 = vector.extract_strided_slice %273 {offsets = [0, 96], sizes = [1, 32], strides = [1, 1]} : vector<1x128xf32> to vector<1x32xf32>
    %277 = vector.extract_strided_slice %268 {offsets = [0, 64], sizes = [1, 32], strides = [1, 1]} : vector<1x128xf32> to vector<1x32xf32>
    %278 = math.tanh %277 : vector<1x32xf32>
    %279 = arith.mulf %275, %262 : vector<1x32xf32>
    %280 = arith.mulf %274, %278 : vector<1x32xf32>
    %281 = arith.addf %279, %280 : vector<1x32xf32>
    %282 = math.tanh %281 : vector<1x32xf32>
    %283 = arith.mulf %276, %282 : vector<1x32xf32>
    %c13_86 = arith.constant 13 : index
    %c0_87 = arith.constant 0 : index
    %284 = vector.load %arg5[%c13_86, %c0_87] : memref<16x32xf32, #tpu.memory_space<vmem>>, vector<1x32xf32>
    tpu.vector_store %arg5[%c13_86, %c0_87], %283 {strides = array<i32>} : memref<16x32xf32, #tpu.memory_space<vmem>>, vector<1x32xf32>,
    %c14 = arith.constant 14 : index
    %c0_88 = arith.constant 0 : index
    %285 = vector.load %arg4[%c14, %c0_88] : memref<16x128xf32, #tpu.memory_space<vmem>>, vector<1x128xf32>
    %cst_89 = arith.constant dense<0.000000e+00> : vector<1x128xf32>
    %286 = tpu.matmul %283, %16, %cst_89 {dimension_numbers = #tpu.dot_dimension_numbers<[1], [0], [0], [1], [0, 0, 1, 1], [], []>} : vector<1x32xf32>, vector<32x128xf32>, vector<1x128xf32> -> vector<1x128xf32>
    %287 = arith.addf %285, %286 : vector<1x128xf32>
    %288 = arith.negf %287 : vector<1x128xf32>
    %289 = math.exp %288 : vector<1x128xf32>
    %cst_90 = arith.constant 1.000000e+00 : f32
    %290 = vector.broadcast %cst_90 : f32 to vector<1x128xf32>
    %291 = arith.addf %290, %289 : vector<1x128xf32>
    %292 = arith.divf %290, %291 : vector<1x128xf32>
    %293 = vector.extract_strided_slice %292 {offsets = [0, 0], sizes = [1, 32], strides = [1, 1]} : vector<1x128xf32> to vector<1x32xf32>
    %294 = vector.extract_strided_slice %292 {offsets = [0, 32], sizes = [1, 32], strides = [1, 1]} : vector<1x128xf32> to vector<1x32xf32>
    %295 = vector.extract_strided_slice %292 {offsets = [0, 96], sizes = [1, 32], strides = [1, 1]} : vector<1x128xf32> to vector<1x32xf32>
    %296 = vector.extract_strided_slice %287 {offsets = [0, 64], sizes = [1, 32], strides = [1, 1]} : vector<1x128xf32> to vector<1x32xf32>
    %297 = math.tanh %296 : vector<1x32xf32>
    %298 = arith.mulf %294, %281 : vector<1x32xf32>
    %299 = arith.mulf %293, %297 : vector<1x32xf32>
    %300 = arith.addf %298, %299 : vector<1x32xf32>
    %301 = math.tanh %300 : vector<1x32xf32>
    %302 = arith.mulf %295, %301 : vector<1x32xf32>
    %c14_91 = arith.constant 14 : index
    %c0_92 = arith.constant 0 : index
    %303 = vector.load %arg5[%c14_91, %c0_92] : memref<16x32xf32, #tpu.memory_space<vmem>>, vector<1x32xf32>
    tpu.vector_store %arg5[%c14_91, %c0_92], %302 {strides = array<i32>} : memref<16x32xf32, #tpu.memory_space<vmem>>, vector<1x32xf32>,
    %c15 = arith.constant 15 : index
    %c0_93 = arith.constant 0 : index
    %304 = vector.load %arg4[%c15, %c0_93] : memref<16x128xf32, #tpu.memory_space<vmem>>, vector<1x128xf32>
    %cst_94 = arith.constant dense<0.000000e+00> : vector<1x128xf32>
    %305 = tpu.matmul %302, %16, %cst_94 {dimension_numbers = #tpu.dot_dimension_numbers<[1], [0], [0], [1], [0, 0, 1, 1], [], []>} : vector<1x32xf32>, vector<32x128xf32>, vector<1x128xf32> -> vector<1x128xf32>
    %306 = arith.addf %304, %305 : vector<1x128xf32>
    %307 = arith.negf %306 : vector<1x128xf32>
    %308 = math.exp %307 : vector<1x128xf32>
    %cst_95 = arith.constant 1.000000e+00 : f32
    %309 = vector.broadcast %cst_95 : f32 to vector<1x128xf32>
    %310 = arith.addf %309, %308 : vector<1x128xf32>
    %311 = arith.divf %309, %310 : vector<1x128xf32>
    %312 = vector.extract_strided_slice %311 {offsets = [0, 0], sizes = [1, 32], strides = [1, 1]} : vector<1x128xf32> to vector<1x32xf32>
    %313 = vector.extract_strided_slice %311 {offsets = [0, 32], sizes = [1, 32], strides = [1, 1]} : vector<1x128xf32> to vector<1x32xf32>
    %314 = vector.extract_strided_slice %311 {offsets = [0, 96], sizes = [1, 32], strides = [1, 1]} : vector<1x128xf32> to vector<1x32xf32>
    %315 = vector.extract_strided_slice %306 {offsets = [0, 64], sizes = [1, 32], strides = [1, 1]} : vector<1x128xf32> to vector<1x32xf32>
    %316 = math.tanh %315 : vector<1x32xf32>
    %317 = arith.mulf %313, %300 : vector<1x32xf32>
    %318 = arith.mulf %312, %316 : vector<1x32xf32>
    %319 = arith.addf %317, %318 : vector<1x32xf32>
    %320 = math.tanh %319 : vector<1x32xf32>
    %321 = arith.mulf %314, %320 : vector<1x32xf32>
    %c15_96 = arith.constant 15 : index
    %c0_97 = arith.constant 0 : index
    %322 = vector.load %arg5[%c15_96, %c0_97] : memref<16x32xf32, #tpu.memory_space<vmem>>, vector<1x32xf32>
    tpu.vector_store %arg5[%c15_96, %c0_97], %321 {strides = array<i32>} : memref<16x32xf32, #tpu.memory_space<vmem>>, vector<1x32xf32>,
    %c0_98 = arith.constant 0 : index
    %c0_99 = arith.constant 0 : index
    %323 = vector.load %arg5[%c0_98, %c0_99] : memref<16x32xf32, #tpu.memory_space<vmem>>, vector<16x32xf32>
    %c88 = arith.constant 88 : index
    %c0_100 = arith.constant 0 : index
    %324 = vector.load %arg0[%c88, %c0_100] : memref<224x128xf32, #tpu.memory_space<vmem>>, vector<32x16xf32>
    %cst_101 = arith.constant dense<0.000000e+00> : vector<16x16xf32>
    %325 = tpu.matmul %323, %324, %cst_101 {dimension_numbers = #tpu.dot_dimension_numbers<[1], [0], [0], [1], [0, 0, 1, 1], [], []>} : vector<16x32xf32>, vector<32x16xf32>, vector<16x16xf32> -> vector<16x16xf32>
    %c0_102 = arith.constant 0 : index
    %c0_103 = arith.constant 0 : index
    %326 = vector.load %arg1[%c0_102, %c0_103] : memref<16x16xf32, #tpu.memory_space<vmem>>, vector<16x16xf32>
    %cst_104 = arith.constant dense<0.000000e+00> : vector<16x16xf32>
    %327 = tpu.matmul %326, %325, %cst_104 {dimension_numbers = #tpu.dot_dimension_numbers<[1], [0], [0], [1], [0, 0, 1, 1], [], []>} : vector<16x16xf32>, vector<16x16xf32>, vector<16x16xf32> -> vector<16x16xf32>
    %c120 = arith.constant 120 : index
    %c0_105 = arith.constant 0 : index
    %328 = vector.load %arg0[%c120, %c0_105] : memref<224x128xf32, #tpu.memory_space<vmem>>, vector<1x16xf32>
    %329 = vector.broadcast %328 : vector<1x16xf32> to vector<16x16xf32>
    %330 = arith.addf %327, %329 : vector<16x16xf32>
    %cst_106 = arith.constant 0.000000e+00 : f32
    %331 = vector.broadcast %cst_106 : f32 to vector<16x16xf32>
    %332 = arith.maximumf %330, %331 : vector<16x16xf32>
    %c128 = arith.constant 128 : index
    %c0_107 = arith.constant 0 : index
    %333 = vector.load %arg0[%c128, %c0_107] : memref<224x128xf32, #tpu.memory_space<vmem>>, vector<16x16xf32>
    %cst_108 = arith.constant dense<0.000000e+00> : vector<16x16xf32>
    %334 = tpu.matmul %332, %333, %cst_108 {dimension_numbers = #tpu.dot_dimension_numbers<[1], [0], [0], [1], [0, 0, 1, 1], [], []>} : vector<16x16xf32>, vector<16x16xf32>, vector<16x16xf32> -> vector<16x16xf32>
    %c0_109 = arith.constant 0 : index
    %c0_110 = arith.constant 0 : index
    %335 = vector.load %arg1[%c0_109, %c0_110] : memref<16x16xf32, #tpu.memory_space<vmem>>, vector<16x16xf32>
    %cst_111 = arith.constant dense<0.000000e+00> : vector<16x16xf32>
    %336 = tpu.matmul %335, %334, %cst_111 {dimension_numbers = #tpu.dot_dimension_numbers<[1], [0], [0], [1], [0, 0, 1, 1], [], []>} : vector<16x16xf32>, vector<16x16xf32>, vector<16x16xf32> -> vector<16x16xf32>
    %c144 = arith.constant 144 : index
    %c0_112 = arith.constant 0 : index
    %337 = vector.load %arg0[%c144, %c0_112] : memref<224x128xf32, #tpu.memory_space<vmem>>, vector<1x16xf32>
    %338 = vector.broadcast %337 : vector<1x16xf32> to vector<16x16xf32>
    %339 = arith.addf %336, %338 : vector<16x16xf32>
    %cst_113 = arith.constant 0.000000e+00 : f32
    %340 = vector.broadcast %cst_113 : f32 to vector<16x16xf32>
    %341 = arith.maximumf %339, %340 : vector<16x16xf32>
    %c152 = arith.constant 152 : index
    %c0_114 = arith.constant 0 : index
    %342 = vector.load %arg0[%c152, %c0_114] : memref<224x128xf32, #tpu.memory_space<vmem>>, vector<16x16xf32>
    %cst_115 = arith.constant dense<0.000000e+00> : vector<16x16xf32>
    %343 = tpu.matmul %341, %342, %cst_115 {dimension_numbers = #tpu.dot_dimension_numbers<[1], [0], [0], [1], [0, 0, 1, 1], [], []>} : vector<16x16xf32>, vector<16x16xf32>, vector<16x16xf32> -> vector<16x16xf32>
    %c0_116 = arith.constant 0 : index
    %c0_117 = arith.constant 0 : index
    %344 = vector.load %arg1[%c0_116, %c0_117] : memref<16x16xf32, #tpu.memory_space<vmem>>, vector<16x16xf32>
    %cst_118 = arith.constant dense<0.000000e+00> : vector<16x16xf32>
    %345 = tpu.matmul %344, %343, %cst_118 {dimension_numbers = #tpu.dot_dimension_numbers<[1], [0], [0], [1], [0, 0, 1, 1], [], []>} : vector<16x16xf32>, vector<16x16xf32>, vector<16x16xf32> -> vector<16x16xf32>
    %c168 = arith.constant 168 : index
    %c0_119 = arith.constant 0 : index
    %346 = vector.load %arg0[%c168, %c0_119] : memref<224x128xf32, #tpu.memory_space<vmem>>, vector<1x16xf32>
    %347 = vector.broadcast %346 : vector<1x16xf32> to vector<16x16xf32>
    %348 = arith.addf %345, %347 : vector<16x16xf32>
    %cst_120 = arith.constant 0.000000e+00 : f32
    %349 = vector.broadcast %cst_120 : f32 to vector<16x16xf32>
    %350 = arith.maximumf %348, %349 : vector<16x16xf32>
    %c176 = arith.constant 176 : index
    %c0_121 = arith.constant 0 : index
    %351 = vector.load %arg0[%c176, %c0_121] : memref<224x128xf32, #tpu.memory_space<vmem>>, vector<16x16xf32>
    %cst_122 = arith.constant dense<0.000000e+00> : vector<16x16xf32>
    %352 = tpu.matmul %350, %351, %cst_122 {dimension_numbers = #tpu.dot_dimension_numbers<[1], [0], [0], [1], [0, 0, 1, 1], [], []>} : vector<16x16xf32>, vector<16x16xf32>, vector<16x16xf32> -> vector<16x16xf32>
    %c0_123 = arith.constant 0 : index
    %c0_124 = arith.constant 0 : index
    %353 = vector.load %arg1[%c0_123, %c0_124] : memref<16x16xf32, #tpu.memory_space<vmem>>, vector<16x16xf32>
    %cst_125 = arith.constant dense<0.000000e+00> : vector<16x16xf32>
    %354 = tpu.matmul %353, %352, %cst_125 {dimension_numbers = #tpu.dot_dimension_numbers<[1], [0], [0], [1], [0, 0, 1, 1], [], []>} : vector<16x16xf32>, vector<16x16xf32>, vector<16x16xf32> -> vector<16x16xf32>
    %c192 = arith.constant 192 : index
    %c0_126 = arith.constant 0 : index
    %355 = vector.load %arg0[%c192, %c0_126] : memref<224x128xf32, #tpu.memory_space<vmem>>, vector<1x16xf32>
    %356 = vector.broadcast %355 : vector<1x16xf32> to vector<16x16xf32>
    %357 = arith.addf %354, %356 : vector<16x16xf32>
    %cst_127 = arith.constant 0.000000e+00 : f32
    %358 = vector.broadcast %cst_127 : f32 to vector<16x16xf32>
    %359 = arith.maximumf %357, %358 : vector<16x16xf32>
    %c200 = arith.constant 200 : index
    %c0_128 = arith.constant 0 : index
    %360 = vector.load %arg0[%c200, %c0_128] : memref<224x128xf32, #tpu.memory_space<vmem>>, vector<16x128xf32>
    %cst_129 = arith.constant dense<0.000000e+00> : vector<16x128xf32>
    %361 = tpu.matmul %359, %360, %cst_129 {dimension_numbers = #tpu.dot_dimension_numbers<[1], [0], [0], [1], [0, 0, 1, 1], [], []>} : vector<16x16xf32>, vector<16x128xf32>, vector<16x128xf32> -> vector<16x128xf32>
    %c216 = arith.constant 216 : index
    %c0_130 = arith.constant 0 : index
    %362 = vector.load %arg0[%c216, %c0_130] : memref<224x128xf32, #tpu.memory_space<vmem>>, vector<1x128xf32>
    %363 = vector.broadcast %362 : vector<1x128xf32> to vector<16x128xf32>
    %364 = arith.addf %361, %363 : vector<16x128xf32>
    %365 = arith.negf %364 : vector<16x128xf32>
    %366 = math.exp %365 : vector<16x128xf32>
    %cst_131 = arith.constant 1.000000e+00 : f32
    %367 = vector.broadcast %cst_131 : f32 to vector<16x128xf32>
    %368 = arith.addf %367, %366 : vector<16x128xf32>
    %369 = arith.divf %367, %368 : vector<16x128xf32>
    %c0_132 = arith.constant 0 : index
    %c0_133 = arith.constant 0 : index
    %370 = vector.load %arg3[%c0_132, %c0_133] : memref<16x128xf32, #tpu.memory_space<vmem>>, vector<16x128xf32>
    tpu.vector_store %arg3[%c0_132, %c0_133], %369 {strides = array<i32>} : memref<16x128xf32, #tpu.memory_space<vmem>>, vector<16x128xf32>,
    return
  }
}

</mosaic_0001>

<bundles_post_ra>
// kernel: fwd.1
= control target key start
LH: loop header
LB: loop body
LE: loop exit
PB: predicated region body
PF: predicated region fallthrough
CT: control target
= control target key end

     0   :  { %8 = vsyncpa [#allocation5], 0  ;;  %s3742_s0 = inlined_call_operand.hbm [shape: f32[224,128], index: 0, kind: input, shape index: {}]   ;;  %s3743_s1 = inlined_call_operand.vmem [shape: f32[16,16], index: 1, kind: input, shape index: {}]   ;;  %s3744_s2 = inlined_call_operand.vmem [shape: f32[16,8], index: 2, kind: input, shape index: {}]   ;;  %s3745_s3 = inlined_call_operand.hbm [shape: f32[16,128], index: 3, kind: output, shape index: {}]  }
   0x1   :  { %9 = vsyncpa [#allocation6], 0  ;;  %s3396_s12 = smov [#allocation4]  }
   0x2   :  { %s15_s13 = sshll.u32 %s3396_s12, 4  ;;  %s16_s13 = int_to_ptr.vmem [resolvable:$true] %s15_s13 }
   0x3   :  { %s3360_s14 = scalar_lea.vmem %s16_s13, 3584  ;;  %p3365_p1 = scmp.lt.s32.totalorder %s16_s13, %s16_s13 }
   0x4   :  { %p3361_p0 = scmp.ne.s32.totalorder %s16_s13, %s3360_s14  ;;  %p3366_p2 = scmp.lt.s32.totalorder %s3360_s14, %s3360_s14 }
   0x6   :  { %p3367_p3 = por %p3366_p2, %p3365_p1 }
   0x8   :  { %p3368_p4 = pnand %p3367_p3, %p3361_p0 }
   0xa   :  { %3371 = shalt.err (!%p3368_p4)
}
   0xb   :  { %s3397_s15 = smov 128   ;;  %s3398_s16 = smov 8  }
   0xc   :  { %21 = dma.hbm_to_vmem [thread:$0]  %s3742_s0, 3584, %s16_s13, [#allocation5], %s3397_s15, %s3397_s15, %s3398_s16  }
   0xd   :  { %3392 = dma.done.wait [#allocation5], 3584  }
   0xe   :  { %3393 = vsyncadd [#allocation5], 4294963712  ;;  %vm32_vm0 = vcmask 64512   ;;  %v31_v0 = vld [vmem:[#allocation4] sm:$0xff]  ;;  %v30_v2 = vld [vmem:[%s3744_s2 + $0x8] sm:$0xff]  ;;  %vm121_vm1 = vcmask 130048  }
   0xf   :  { %v29_v1 = vld [vmem:[%s3744_s2] sm:$0xff]  ;;  %2938 = vmatprep.subr.mxu0 %v31_v0  ;;  %v115_v6 = vld [vmem:[%s3743_s1 + $0x8] sm:$0xff]  ;;  %v206_v9 = vld [vmem:[#allocation4 + $0x18] sm:$0xff]  ;;  %v3399_v12 = vmov 0.0   ;;  %vm3400_vm2 = vmmov 0   ;;  %vm214_vm3 = vcmask 261120  }
  0x10   :  { %2940 = vmatprep.mubr.msk.f32.mxu0 %vm32_vm0, %v29_v1  ;;  %2939 = vmatpush3.msra.mxu0 %v31_v0  ;;  %v114_v3 = vld [vmem:[%s3743_s1] sm:$0xff]  ;;  %v208_v7 = vld [vmem:[#allocation4 + $0x28] sm:$0xff]  ;;  %v205_v10 = vld [vmem:[#allocation4 + $0x10] sm:$0xff]  ;;  %s3401_s2 = smov 64   ;;  %s3402_s26 = smov 32   ;;  %vm405_vm4 = vcmask 253952  }
  0x11   :  { %2941 = vmatmul.mubr.msk.f32.vlgmr.msra.gmra.mxu0 %vm32_vm0, %v30_v2  ;;  %2947 = vmatprep.mubr.msk.f32.mxu1 %vm121_vm1, %v114_v3  ;;  %v207_v8 = vld [vmem:[#allocation4 + $0x20] sm:$0xff]  ;;  %v3444_v11 = vld [vmem:[#allocation4 + $0x48] sm:$0xff]  ;;  %v3454_v14 = vld [vmem:[#allocation4 + $0x38] sm:$0xff] }
  0x12   :  { %2950 = vmatprep.subr.mxu0 %v208_v7  ;;  %v3447_v13 = vld [vmem:[#allocation4 + $0x40] sm:$0xff]  ;;  %v3458_v15 = vld [vmem:[#allocation4 + $0x30] sm:$0xff]  ;;  %v2745_v16 = vld [vmem:[#allocation4 + $0x8] ss:$0 sm:$0xff] }
  0x13   :  { %2951 = vmatpush3.msra.mxu0 %v208_v7  ;;  %v2748_v25 = vld [vmem:[#allocation4 + $0x50] ss:$0 sm:$0xff] }
  0x14   :  { %2952 = vmatprep.subr.mxu0 %v207_v8 }
  0x15   :  { %2953 = vmatpush3.msra.mxu0 %v207_v8 }
  0x16   :  { %2954 = vmatprep.subr.mxu0 %v206_v9 }
  0x17   :  { %2955 = vmatpush3.msra.mxu0 %v206_v9 }
  0x18   :  { %2956 = vmatprep.subr.mxu0 %v205_v10 }
  0x19   :  { %2957 = vmatpush3.msra.mxu0 %v205_v10 }
  0x1a   :  { %2972 = vmatprep.subr.mxu0 %v3399_v12 }
  0xd1   :  { %v2942_v4 = vpop.f32.mrf.mxu0 }
  0xd2   :  { %2943 = vmatprep.subr.mxu1 %v2942_v4 }
  0xd3   :  { %v105_v5 = vpop.f32.mrf.mxu0  ;;  %2944 = vmatpush3.msra.mxu1 %v2942_v4 }
  0xd4   :  { %2945 = vmatprep.subr.mxu1 %v105_v5 }
  0xd5   :  { %2946 = vmatpush3.msra.mxu1 %v105_v5 }
  0xd6   :  { %2948 = vmatmul.mubr.msk.f32.vlgmr.msra.gmra.mxu1 %vm121_vm1, %v115_v6  ;;  %2961 = vmatprep.subr.mxu1 %v3399_v12 }
  0xd7   :  { %2969 = vmatprep.mubr.msk.f32.mxu1 %vm3400_vm2, %v3399_v12  ;;  %2962 = vmatpush3.msra.mxu1 %v3444_v11 }
  0xd8   :  { %2963 = vmatprep.subr.mxu1 %v3399_v12 }
  0xd9   :  { %2964 = vmatpush3.msra.mxu1 %v3447_v13 }
  0xda   :  { %2965 = vmatprep.subr.mxu1 %v3399_v12 }
  0xdb   :  { %2966 = vmatpush3.msra.mxu1 %v3454_v14 }
  0xdc   :  { %2967 = vmatprep.subr.mxu1 %v3399_v12 }
  0xdd   :  { %2968 = vmatpush3.msra.mxu1 %v3458_v15 }
  0xde   :  { %2970 = vmatmul.mubr.f32.vlgmr.msra.gmra.mxu1 %v3399_v12  ;;  %2983 = vmatprep.subr.mxu1 %v3399_v12 }
  0xdf   :  { %2984 = vmatpush3.msra.mxu1 %v3444_v11  ;;  %2991 = vmatprep.mubr.msk.f32.mxu1 %vm3400_vm2, %v3399_v12 }
  0xe0   :  { %2985 = vmatprep.subr.mxu1 %v3399_v12 }
  0xe1   :  { %2986 = vmatpush3.msra.mxu1 %v3447_v13 }
  0xe2   :  { %2987 = vmatprep.subr.mxu1 %v3399_v12 }
  0xe3   :  { %2988 = vmatpush3.msra.mxu1 %v3454_v14 }
  0xe4   :  { %2989 = vmatprep.subr.mxu1 %v3399_v12 }
  0xe5   :  { %2990 = vmatpush3.msra.mxu1 %v3458_v15 }
  0xe6   :  { %3005 = vmatprep.subr.mxu1 %v3399_v12 }
 0x196   :  { %v2949_v17 = vpop.f32.mrf.mxu1 }
 0x197   :  { %v200_v18 = vadd.f32 %v2949_v17, %v2745_v16 }
 0x198   :  { %v194_v19 = vpop.f32.mrf.mxu1 }
 0x199   :  { %v195_v20 = vadd.f32 %v2745_v16, %v194_v19  ;;  %v204_v22 = vmax.f32 %v200_v18, 0.0 }
 0x19b   :  { %v203_v21 = vmax.f32 %v195_v20, 0.0 }
 0x19d   :  { %2958 = vmatprep.mubr.msk.f32.mxu0 %vm214_vm3, %v203_v21 }
 0x19e   :  { %2959 = vmatmul.mubr.msk.f32.vlgmr.msra.gmra.mxu0 %vm214_vm3, %v204_v22  ;;  %v372_v23 = vpop.f32.mrf.mxu1 }
 0x19f   :  { %2973 = vmatpush3.msra.mxu0 %v3444_v11  ;;  %2980 = vmatprep.mubr.msk.f32.mxu0 %vm3400_vm2, %v3399_v12 }
 0x1a0   :  { %2974 = vmatprep.subr.mxu0 %v3399_v12  ;;  %v2971_v24 = vpop.f32.mrf.mxu1 }
 0x1a1   :  { %2975 = vmatpush3.msra.mxu0 %v3447_v13 }
 0x1a2   :  { %2976 = vmatprep.subr.mxu0 %v3399_v12 }
 0x1a3   :  { %2977 = vmatpush3.msra.mxu0 %v3454_v14 }
 0x1a4   :  { %2978 = vmatprep.subr.mxu0 %v3399_v12 }
 0x1a5   :  { %2979 = vmatpush3.msra.mxu0 %v3458_v15 }
 0x1a6   :  { %2994 = vmatprep.subr.mxu0 %v3399_v12 }
 0x25e   :  { %v2960_v26 = vpop.f32.mrf.mxu0 }
 0x25f   :  { %v293_v27 = vadd.f32 %v2960_v26, %v2748_v25 }
 0x260   :  { %v287_v28 = vpop.f32.mrf.mxu0 }
 0x261   :  { %297 = vst [vmem:[#allocation2 + $0x8] sm:$0xff] %v293_v27  ;;  %v288_v29 = vadd.f32 %v2748_v25, %v287_v28 }
 0x263   :  { %296 = vst [vmem:[#allocation2] sm:$0xff] %v288_v29 }
 0x26a   :  { %v302_v30 = vld [vmem:[#allocation2] sm:$0x1]  ;;  %v407_v46 = vld [vmem:[#allocation2 + $0x1] sm:$0x1]  ;;  %v510_v0 = vld [vmem:[#allocation2 + $0x2] sm:$0x1] }
 0x26b   :  { %v376_v31 = vadd.f32 %v372_v23, %v302_v30  ;;  %v613_v23 = vld [vmem:[#allocation2 + $0x3] sm:$0x1] }
 0x26d   :  { %3212 = vtanh.f32 %v376_v31  ;;  %v2751_v33 = vmul.f32 -1.442695, %v376_v31 }
 0x26f   :  { %3214 = vpow2.f32 %v2751_v33 }
 0x27a   :  { %v3213_v32 = vpop.eup %3212 }
 0x27b   :  { %386 = vrot.lane.b32.xlu0 %v3213_v32, %s3401_s2 }
 0x27c   :  { %v3215_v34 = vpop.eup %3214 }
 0x27d   :  { %v380_v35 = vadd.f32 1.0, %v3215_v34 }
 0x27f   :  { %3216 = vrcp.f32 %v380_v35 }
 0x28c   :  { %v3217_v36 = vpop.eup %3216 }
 0x28d   :  { %v384_v39 = vmul.f32 0.0, %v3217_v36 }
 0x2ed   :  { %v387_v37 = vpop.permute.xlu0 %386 }
 0x2ee   :  { %v389_v38 = vmul.f32 %v3217_v36, %v387_v37 }
 0x2f0   :  { %391 = vrot.lane.b32.xlu0 %v389_v38, %s3402_s26 }
 0x362   :  { %v392_v40 = vpop.permute.xlu0 %391 }
 0x363   :  { %v394_v41 = vadd.f32 %v392_v40, %v384_v39 }
 0x365   :  { %3218 = vtanh.f32 %v394_v41 }
 0x372   :  { %v3219_v42 = vpop.eup %3218 }
 0x373   :  { %397 = vrot.lane.b32.xlu1 %v3219_v42, %s3401_s2 }
 0x3e5   :  { %v398_v43 = vpop.permute.xlu1 %397 }
 0x3e6   :  { %v400_v44 = vmul.f32 %v3217_v36, %v398_v43 }
 0x3e8   :  { %402 = vrot.lane.b32.xlu1 %v400_v44, %s3402_s26 }
 0x45a   :  { %v403_v45 = vpop.permute.xlu1 %402 }
 0x45b   :  { %406 = vst.msk [vmem:[#allocation3] sm:$0x1] %vm405_vm4, %v403_v45  ;;  %2981 = vmatmul.mubr.msk.f32.vlgmr.msra.gmra.mxu0 %vm214_vm3, %v403_v45 }
 0x45c   :  { %2995 = vmatpush3.msra.mxu0 %v3444_v11  ;;  %3002 = vmatprep.mubr.msk.f32.mxu0 %vm3400_vm2, %v3399_v12 }
 0x45d   :  { %2996 = vmatprep.subr.mxu0 %v3399_v12 }
 0x45e   :  { %2997 = vmatpush3.msra.mxu0 %v3447_v13 }
 0x45f   :  { %2998 = vmatprep.subr.mxu0 %v3399_v12 }
 0x460   :  { %2999 = vmatpush3.msra.mxu0 %v3454_v14 }
 0x461   :  { %3000 = vmatprep.subr.mxu0 %v3399_v12 }
 0x462   :  { %3001 = vmatpush3.msra.mxu0 %v3458_v15 }
 0x463   :  { %3016 = vmatprep.subr.mxu0 %v3399_v12 }
 0x51b   :  { %v476_v47 = vpop.f32.mrf.mxu0 }
 0x51c   :  { %v480_v48 = vadd.f32 %v476_v47, %v407_v46 }
 0x51d   :  { %v2982_v49 = vpop.f32.mrf.mxu0 }
 0x51e   :  { %3220 = vtanh.f32 %v480_v48  ;;  %v2753_v51 = vmul.f32 -1.442695, %v480_v48 }
 0x520   :  { %3222 = vpow2.f32 %v2753_v51 }
 0x52b   :  { %v3221_v50 = vpop.eup %3220 }
 0x52c   :  { %490 = vrot.lane.b32.xlu0 %v3221_v50, %s3401_s2 }
 0x52d   :  { %v3223_v52 = vpop.eup %3222 }
 0x52e   :  { %v484_v53 = vadd.f32 1.0, %v3223_v52 }
 0x530   :  { %3224 = vrcp.f32 %v484_v53 }
 0x53d   :  { %v3225_v54 = vpop.eup %3224 }
 0x53e   :  { %v488_v57 = vmul.f32 %v3225_v54, %v394_v41  ;;  %v716_v41 = vld [vmem:[#allocation2 + $0x4] sm:$0x1] }
 0x59e   :  { %v491_v55 = vpop.permute.xlu0 %490 }
 0x59f   :  { %v493_v56 = vmul.f32 %v3225_v54, %v491_v55 }
 0x5a1   :  { %495 = vrot.lane.b32.xlu1 %v493_v56, %s3402_s26 }
 0x613   :  { %v496_v58 = vpop.permute.xlu1 %495 }
 0x614   :  { %v498_v59 = vadd.f32 %v496_v58, %v488_v57 }
 0x616   :  { %3226 = vtanh.f32 %v498_v59 }
 0x623   :  { %v3227_v60 = vpop.eup %3226 }
 0x624   :  { %501 = vrot.lane.b32.xlu0 %v3227_v60, %s3401_s2 }
 0x696   :  { %v502_v61 = vpop.permute.xlu0 %501 }
 0x697   :  { %v504_v62 = vmul.f32 %v3225_v54, %v502_v61 }
 0x699   :  { %506 = vrot.lane.b32.xlu1 %v504_v62, %s3402_s26 }
 0x70b   :  { %v507_v63 = vpop.permute.xlu1 %506 }
 0x70c   :  { %509 = vst.msk [vmem:[#allocation3 + $0x1] sm:$0x1] %vm405_vm4, %v507_v63  ;;  %2992 = vmatmul.mubr.msk.f32.vlgmr.msra.gmra.mxu1 %vm214_vm3, %v507_v63 }
 0x70d   :  { %3006 = vmatpush3.msra.mxu1 %v3444_v11  ;;  %3013 = vmatprep.mubr.msk.f32.mxu1 %vm3400_vm2, %v3399_v12 }
 0x70e   :  { %3007 = vmatprep.subr.mxu1 %v3399_v12 }
 0x70f   :  { %3008 = vmatpush3.msra.mxu1 %v3447_v13 }
 0x710   :  { %3009 = vmatprep.subr.mxu1 %v3399_v12 }
 0x711   :  { %3010 = vmatpush3.msra.mxu1 %v3454_v14 }
 0x712   :  { %3011 = vmatprep.subr.mxu1 %v3399_v12 }
 0x713   :  { %3012 = vmatpush3.msra.mxu1 %v3458_v15 }
 0x714   :  { %3027 = vmatprep.subr.mxu1 %v3399_v12 }
 0x7cc   :  { %v579_v1 = vpop.f32.mrf.mxu1 }
 0x7cd   :  { %v583_v2 = vadd.f32 %v579_v1, %v510_v0 }
 0x7ce   :  { %v2993_v3 = vpop.f32.mrf.mxu1 }
 0x7cf   :  { %3228 = vtanh.f32 %v583_v2  ;;  %v2755_v5 = vmul.f32 -1.442695, %v583_v2 }
 0x7d1   :  { %3230 = vpow2.f32 %v2755_v5 }
 0x7dc   :  { %v3229_v4 = vpop.eup %3228 }
 0x7dd   :  { %593 = vrot.lane.b32.xlu0 %v3229_v4, %s3401_s2 }
 0x7de   :  { %v3231_v6 = vpop.eup %3230 }
 0x7df   :  { %v587_v7 = vadd.f32 1.0, %v3231_v6 }
 0x7e1   :  { %3232 = vrcp.f32 %v587_v7 }
 0x7ee   :  { %v3233_v8 = vpop.eup %3232 }
 0x7ef   :  { %v591_v16 = vmul.f32 %v3233_v8, %v498_v59  ;;  %v819_v59 = vld [vmem:[#allocation2 + $0x5] sm:$0x1] }
 0x84f   :  { %v594_v9 = vpop.permute.xlu0 %593 }
 0x850   :  { %v596_v10 = vmul.f32 %v3233_v8, %v594_v9 }
 0x852   :  { %598 = vrot.lane.b32.xlu1 %v596_v10, %s3402_s26 }
 0x8c4   :  { %v599_v17 = vpop.permute.xlu1 %598 }
 0x8c5   :  { %v601_v18 = vadd.f32 %v599_v17, %v591_v16 }
 0x8c7   :  { %3234 = vtanh.f32 %v601_v18 }
 0x8d4   :  { %v3235_v19 = vpop.eup %3234 }
 0x8d5   :  { %604 = vrot.lane.b32.xlu0 %v3235_v19, %s3401_s2 }
 0x947   :  { %v605_v20 = vpop.permute.xlu0 %604 }
 0x948   :  { %v607_v21 = vmul.f32 %v3233_v8, %v605_v20 }
 0x94a   :  { %609 = vrot.lane.b32.xlu1 %v607_v21, %s3402_s26 }
 0x9bc   :  { %v610_v22 = vpop.permute.xlu1 %609 }
 0x9bd   :  { %612 = vst.msk [vmem:[#allocation3 + $0x2] sm:$0x1] %vm405_vm4, %v610_v22  ;;  %3003 = vmatmul.mubr.msk.f32.vlgmr.msra.gmra.mxu0 %vm214_vm3, %v610_v22 }
 0x9be   :  { %3017 = vmatpush3.msra.mxu0 %v3444_v11  ;;  %3024 = vmatprep.mubr.msk.f32.mxu0 %vm3400_vm2, %v3399_v12 }
 0x9bf   :  { %3018 = vmatprep.subr.mxu0 %v3399_v12 }
 0x9c0   :  { %3019 = vmatpush3.msra.mxu0 %v3447_v13 }
 0x9c1   :  { %3020 = vmatprep.subr.mxu0 %v3399_v12 }
 0x9c2   :  { %3021 = vmatpush3.msra.mxu0 %v3454_v14 }
 0x9c3   :  { %3022 = vmatprep.subr.mxu0 %v3399_v12 }
 0x9c4   :  { %3023 = vmatpush3.msra.mxu0 %v3458_v15 }
 0x9c5   :  { %3038 = vmatprep.subr.mxu0 %v3399_v12 }
 0xa7d   :  { %v682_v24 = vpop.f32.mrf.mxu0 }
 0xa7e   :  { %v686_v25 = vadd.f32 %v682_v24, %v613_v23 }
 0xa7f   :  { %v3004_v26 = vpop.f32.mrf.mxu0 }
 0xa80   :  { %3236 = vtanh.f32 %v686_v25  ;;  %v2757_v28 = vmul.f32 -1.442695, %v686_v25 }
 0xa82   :  { %3238 = vpow2.f32 %v2757_v28 }
 0xa8d   :  { %v3237_v27 = vpop.eup %3236 }
 0xa8e   :  { %696 = vrot.lane.b32.xlu0 %v3237_v27, %s3401_s2 }
 0xa8f   :  { %v3239_v29 = vpop.eup %3238 }
 0xa90   :  { %v690_v30 = vadd.f32 1.0, %v3239_v29 }
 0xa92   :  { %3240 = vrcp.f32 %v690_v30 }
 0xa9f   :  { %v3241_v31 = vpop.eup %3240 }
 0xaa0   :  { %v694_v34 = vmul.f32 %v3241_v31, %v601_v18  ;;  %v922_v18 = vld [vmem:[#allocation2 + $0x6] sm:$0x1] }
 0xb00   :  { %v697_v32 = vpop.permute.xlu0 %696 }
 0xb01   :  { %v699_v33 = vmul.f32 %v3241_v31, %v697_v32 }
 0xb03   :  { %701 = vrot.lane.b32.xlu1 %v699_v33, %s3402_s26 }
 0xb75   :  { %v702_v35 = vpop.permute.xlu1 %701 }
 0xb76   :  { %v704_v36 = vadd.f32 %v702_v35, %v694_v34 }
 0xb78   :  { %3242 = vtanh.f32 %v704_v36 }
 0xb85   :  { %v3243_v37 = vpop.eup %3242 }
 0xb86   :  { %707 = vrot.lane.b32.xlu0 %v3243_v37, %s3401_s2 }
 0xbf8   :  { %v708_v38 = vpop.permute.xlu0 %707 }
 0xbf9   :  { %v710_v39 = vmul.f32 %v3241_v31, %v708_v38 }
 0xbfb   :  { %712 = vrot.lane.b32.xlu1 %v710_v39, %s3402_s26 }
 0xc6d   :  { %v713_v40 = vpop.permute.xlu1 %712 }
 0xc6e   :  { %715 = vst.msk [vmem:[#allocation3 + $0x3] sm:$0x1] %vm405_vm4, %v713_v40  ;;  %3014 = vmatmul.mubr.msk.f32.vlgmr.msra.gmra.mxu1 %vm214_vm3, %v713_v40 }
 0xc6f   :  { %3028 = vmatpush3.msra.mxu1 %v3444_v11  ;;  %3035 = vmatprep.mubr.msk.f32.mxu1 %vm3400_vm2, %v3399_v12 }
 0xc70   :  { %3029 = vmatprep.subr.mxu1 %v3399_v12 }
 0xc71   :  { %3030 = vmatpush3.msra.mxu1 %v3447_v13 }
 0xc72   :  { %3031 = vmatprep.subr.mxu1 %v3399_v12 }
 0xc73   :  { %3032 = vmatpush3.msra.mxu1 %v3454_v14 }
 0xc74   :  { %3033 = vmatprep.subr.mxu1 %v3399_v12 }
 0xc75   :  { %3034 = vmatpush3.msra.mxu1 %v3458_v15 }
 0xc76   :  { %3049 = vmatprep.subr.mxu1 %v3399_v12 }
 0xd2e   :  { %v785_v42 = vpop.f32.mrf.mxu1 }
 0xd2f   :  { %v789_v43 = vadd.f32 %v785_v42, %v716_v41 }
 0xd30   :  { %v3015_v44 = vpop.f32.mrf.mxu1 }
 0xd31   :  { %3244 = vtanh.f32 %v789_v43  ;;  %v2759_v46 = vmul.f32 -1.442695, %v789_v43 }
 0xd33   :  { %3246 = vpow2.f32 %v2759_v46 }
 0xd3e   :  { %v3245_v45 = vpop.eup %3244 }
 0xd3f   :  { %799 = vrot.lane.b32.xlu0 %v3245_v45, %s3401_s2 }
 0xd40   :  { %v3247_v47 = vpop.eup %3246 }
 0xd41   :  { %v793_v48 = vadd.f32 1.0, %v3247_v47 }
 0xd43   :  { %3248 = vrcp.f32 %v793_v48 }
 0xd50   :  { %v3249_v49 = vpop.eup %3248 }
 0xd51   :  { %v797_v52 = vmul.f32 %v3249_v49, %v704_v36  ;;  %v1025_v36 = vld [vmem:[#allocation2 + $0x7] sm:$0x1] }
 0xdb1   :  { %v800_v50 = vpop.permute.xlu0 %799 }
 0xdb2   :  { %v802_v51 = vmul.f32 %v3249_v49, %v800_v50 }
 0xdb4   :  { %804 = vrot.lane.b32.xlu1 %v802_v51, %s3402_s26 }
 0xe26   :  { %v805_v53 = vpop.permute.xlu1 %804 }
 0xe27   :  { %v807_v54 = vadd.f32 %v805_v53, %v797_v52 }
 0xe29   :  { %3250 = vtanh.f32 %v807_v54 }
 0xe36   :  { %v3251_v55 = vpop.eup %3250 }
 0xe37   :  { %810 = vrot.lane.b32.xlu0 %v3251_v55, %s3401_s2 }
 0xea9   :  { %v811_v56 = vpop.permute.xlu0 %810 }
 0xeaa   :  { %v813_v57 = vmul.f32 %v3249_v49, %v811_v56 }
 0xeac   :  { %815 = vrot.lane.b32.xlu1 %v813_v57, %s3402_s26 }
 0xf1e   :  { %v816_v58 = vpop.permute.xlu1 %815 }
 0xf1f   :  { %818 = vst.msk [vmem:[#allocation3 + $0x4] sm:$0x1] %vm405_vm4, %v816_v58  ;;  %3025 = vmatmul.mubr.msk.f32.vlgmr.msra.gmra.mxu0 %vm214_vm3, %v816_v58 }
 0xf20   :  { %3039 = vmatpush3.msra.mxu0 %v3444_v11  ;;  %3046 = vmatprep.mubr.msk.f32.mxu0 %vm3400_vm2, %v3399_v12 }
 0xf21   :  { %3040 = vmatprep.subr.mxu0 %v3399_v12 }
 0xf22   :  { %3041 = vmatpush3.msra.mxu0 %v3447_v13 }
 0xf23   :  { %3042 = vmatprep.subr.mxu0 %v3399_v12 }
 0xf24   :  { %3043 = vmatpush3.msra.mxu0 %v3454_v14 }
 0xf25   :  { %3044 = vmatprep.subr.mxu0 %v3399_v12 }
 0xf26   :  { %3045 = vmatpush3.msra.mxu0 %v3458_v15 }
 0xf27   :  { %3060 = vmatprep.subr.mxu0 %v3399_v12 }
 0xfdf   :  { %v888_v60 = vpop.f32.mrf.mxu0 }
 0xfe0   :  { %v892_v61 = vadd.f32 %v888_v60, %v819_v59 }
 0xfe1   :  { %v3026_v62 = vpop.f32.mrf.mxu0 }
 0xfe2   :  { %3252 = vtanh.f32 %v892_v61  ;;  %v2761_v0 = vmul.f32 -1.442695, %v892_v61 }
 0xfe4   :  { %3254 = vpow2.f32 %v2761_v0 }
 0xfef   :  { %v3253_v63 = vpop.eup %3252 }
 0xff0   :  { %902 = vrot.lane.b32.xlu0 %v3253_v63, %s3401_s2 }
 0xff1   :  { %v3255_v1 = vpop.eup %3254 }
 0xff2   :  { %v896_v2 = vadd.f32 1.0, %v3255_v1 }
 0xff4   :  { %3256 = vrcp.f32 %v896_v2 }
0x1001   :  { %v3257_v3 = vpop.eup %3256 }
0x1002   :  { %v900_v6 = vmul.f32 %v3257_v3, %v807_v54  ;;  %v1128_v54 = vld [vmem:[#allocation2 + $0x8] sm:$0x1] }
0x1062   :  { %v903_v4 = vpop.permute.xlu0 %902 }
0x1063   :  { %v905_v5 = vmul.f32 %v3257_v3, %v903_v4 }
0x1065   :  { %907 = vrot.lane.b32.xlu1 %v905_v5, %s3402_s26 }
0x10d7   :  { %v908_v7 = vpop.permute.xlu1 %907 }
0x10d8   :  { %v910_v8 = vadd.f32 %v908_v7, %v900_v6 }
0x10da   :  { %3258 = vtanh.f32 %v910_v8 }
0x10e7   :  { %v3259_v9 = vpop.eup %3258 }
0x10e8   :  { %913 = vrot.lane.b32.xlu0 %v3259_v9, %s3401_s2 }
0x115a   :  { %v914_v10 = vpop.permute.xlu0 %913 }
0x115b   :  { %v916_v16 = vmul.f32 %v3257_v3, %v914_v10 }
0x115d   :  { %918 = vrot.lane.b32.xlu1 %v916_v16, %s3402_s26 }
0x11cf   :  { %v919_v17 = vpop.permute.xlu1 %918 }
0x11d0   :  { %921 = vst.msk [vmem:[#allocation3 + $0x5] sm:$0x1] %vm405_vm4, %v919_v17  ;;  %3036 = vmatmul.mubr.msk.f32.vlgmr.msra.gmra.mxu1 %vm214_vm3, %v919_v17 }
0x11d1   :  { %3050 = vmatpush3.msra.mxu1 %v3444_v11  ;;  %3057 = vmatprep.mubr.msk.f32.mxu1 %vm3400_vm2, %v3399_v12 }
0x11d2   :  { %3051 = vmatprep.subr.mxu1 %v3399_v12 }
0x11d3   :  { %3052 = vmatpush3.msra.mxu1 %v3447_v13 }
0x11d4   :  { %3053 = vmatprep.subr.mxu1 %v3399_v12 }
0x11d5   :  { %3054 = vmatpush3.msra.mxu1 %v3454_v14 }
0x11d6   :  { %3055 = vmatprep.subr.mxu1 %v3399_v12 }
0x11d7   :  { %3056 = vmatpush3.msra.mxu1 %v3458_v15 }
0x11d8   :  { %3071 = vmatprep.subr.mxu1 %v3399_v12 }
0x1290   :  { %v991_v19 = vpop.f32.mrf.mxu1 }
0x1291   :  { %v995_v20 = vadd.f32 %v991_v19, %v922_v18 }
0x1292   :  { %v3037_v21 = vpop.f32.mrf.mxu1 }
0x1293   :  { %3260 = vtanh.f32 %v995_v20  ;;  %v2763_v23 = vmul.f32 -1.442695, %v995_v20 }
0x1295   :  { %3262 = vpow2.f32 %v2763_v23 }
0x12a0   :  { %v3261_v22 = vpop.eup %3260 }
0x12a1   :  { %1005 = vrot.lane.b32.xlu0 %v3261_v22, %s3401_s2 }
0x12a2   :  { %v3263_v24 = vpop.eup %3262 }
0x12a3   :  { %v999_v25 = vadd.f32 1.0, %v3263_v24 }
0x12a5   :  { %3264 = vrcp.f32 %v999_v25 }
0x12b2   :  { %v3265_v26 = vpop.eup %3264 }
0x12b3   :  { %v1003_v29 = vmul.f32 %v3265_v26, %v910_v8  ;;  %v1231_v8 = vld [vmem:[#allocation2 + $0x9] sm:$0x1] }
0x1313   :  { %v1006_v27 = vpop.permute.xlu0 %1005 }
0x1314   :  { %v1008_v28 = vmul.f32 %v3265_v26, %v1006_v27 }
0x1316   :  { %1010 = vrot.lane.b32.xlu1 %v1008_v28, %s3402_s26 }
0x1388   :  { %v1011_v30 = vpop.permute.xlu1 %1010 }
0x1389   :  { %v1013_v31 = vadd.f32 %v1011_v30, %v1003_v29 }
0x138b   :  { %3266 = vtanh.f32 %v1013_v31 }
0x1398   :  { %v3267_v32 = vpop.eup %3266 }
0x1399   :  { %1016 = vrot.lane.b32.xlu0 %v3267_v32, %s3401_s2 }
0x140b   :  { %v1017_v33 = vpop.permute.xlu0 %1016 }
0x140c   :  { %v1019_v34 = vmul.f32 %v3265_v26, %v1017_v33 }
0x140e   :  { %1021 = vrot.lane.b32.xlu1 %v1019_v34, %s3402_s26 }
0x1480   :  { %v1022_v35 = vpop.permute.xlu1 %1021 }
0x1481   :  { %1024 = vst.msk [vmem:[#allocation3 + $0x6] sm:$0x1] %vm405_vm4, %v1022_v35  ;;  %3047 = vmatmul.mubr.msk.f32.vlgmr.msra.gmra.mxu0 %vm214_vm3, %v1022_v35 }
0x1482   :  { %3061 = vmatpush3.msra.mxu0 %v3444_v11  ;;  %3068 = vmatprep.mubr.msk.f32.mxu0 %vm3400_vm2, %v3399_v12 }
0x1483   :  { %3062 = vmatprep.subr.mxu0 %v3399_v12 }
0x1484   :  { %3063 = vmatpush3.msra.mxu0 %v3447_v13 }
0x1485   :  { %3064 = vmatprep.subr.mxu0 %v3399_v12 }
0x1486   :  { %3065 = vmatpush3.msra.mxu0 %v3454_v14 }
0x1487   :  { %3066 = vmatprep.subr.mxu0 %v3399_v12 }
0x1488   :  { %3067 = vmatpush3.msra.mxu0 %v3458_v15 }
0x1489   :  { %3082 = vmatprep.subr.mxu0 %v3399_v12 }
0x1541   :  { %v1094_v37 = vpop.f32.mrf.mxu0 }
0x1542   :  { %v1098_v38 = vadd.f32 %v1094_v37, %v1025_v36 }
0x1543   :  { %v3048_v39 = vpop.f32.mrf.mxu0 }
0x1544   :  { %3268 = vtanh.f32 %v1098_v38  ;;  %v2765_v41 = vmul.f32 -1.442695, %v1098_v38 }
0x1546   :  { %3270 = vpow2.f32 %v2765_v41 }
0x1551   :  { %v3269_v40 = vpop.eup %3268 }
0x1552   :  { %1108 = vrot.lane.b32.xlu0 %v3269_v40, %s3401_s2 }
0x1553   :  { %v3271_v42 = vpop.eup %3270 }
0x1554   :  { %v1102_v43 = vadd.f32 1.0, %v3271_v42 }
0x1556   :  { %3272 = vrcp.f32 %v1102_v43 }
0x1563   :  { %v3273_v44 = vpop.eup %3272 }
0x1564   :  { %v1106_v47 = vmul.f32 %v3273_v44, %v1013_v31  ;;  %v1334_v31 = vld [vmem:[#allocation2 + $0xa] sm:$0x1] }
0x15c4   :  { %v1109_v45 = vpop.permute.xlu0 %1108 }
0x15c5   :  { %v1111_v46 = vmul.f32 %v3273_v44, %v1109_v45 }
0x15c7   :  { %1113 = vrot.lane.b32.xlu1 %v1111_v46, %s3402_s26 }
0x1639   :  { %v1114_v48 = vpop.permute.xlu1 %1113 }
0x163a   :  { %v1116_v49 = vadd.f32 %v1114_v48, %v1106_v47 }
0x163c   :  { %3274 = vtanh.f32 %v1116_v49 }
0x1649   :  { %v3275_v50 = vpop.eup %3274 }
0x164a   :  { %1119 = vrot.lane.b32.xlu0 %v3275_v50, %s3401_s2 }
0x16bc   :  { %v1120_v51 = vpop.permute.xlu0 %1119 }
0x16bd   :  { %v1122_v52 = vmul.f32 %v3273_v44, %v1120_v51 }
0x16bf   :  { %1124 = vrot.lane.b32.xlu1 %v1122_v52, %s3402_s26 }
0x1731   :  { %v1125_v53 = vpop.permute.xlu1 %1124 }
0x1732   :  { %1127 = vst.msk [vmem:[#allocation3 + $0x7] sm:$0x1] %vm405_vm4, %v1125_v53  ;;  %3058 = vmatmul.mubr.msk.f32.vlgmr.msra.gmra.mxu1 %vm214_vm3, %v1125_v53 }
0x1733   :  { %3072 = vmatpush3.msra.mxu1 %v3444_v11  ;;  %3079 = vmatprep.mubr.msk.f32.mxu1 %vm3400_vm2, %v3399_v12 }
0x1734   :  { %3073 = vmatprep.subr.mxu1 %v3399_v12 }
0x1735   :  { %3074 = vmatpush3.msra.mxu1 %v3447_v13 }
0x1736   :  { %3075 = vmatprep.subr.mxu1 %v3399_v12 }
0x1737   :  { %3076 = vmatpush3.msra.mxu1 %v3454_v14 }
0x1738   :  { %3077 = vmatprep.subr.mxu1 %v3399_v12 }
0x1739   :  { %3078 = vmatpush3.msra.mxu1 %v3458_v15 }
0x173a   :  { %3093 = vmatprep.subr.mxu1 %v3399_v12 }
0x17f2   :  { %v1197_v55 = vpop.f32.mrf.mxu1 }
0x17f3   :  { %v1201_v56 = vadd.f32 %v1197_v55, %v1128_v54 }
0x17f4   :  { %v3059_v57 = vpop.f32.mrf.mxu1 }
0x17f5   :  { %3276 = vtanh.f32 %v1201_v56  ;;  %v2767_v59 = vmul.f32 -1.442695, %v1201_v56 }
0x17f7   :  { %3278 = vpow2.f32 %v2767_v59 }
0x1802   :  { %v3277_v58 = vpop.eup %3276 }
0x1803   :  { %1211 = vrot.lane.b32.xlu0 %v3277_v58, %s3401_s2 }
0x1804   :  { %v3279_v60 = vpop.eup %3278 }
0x1805   :  { %v1205_v61 = vadd.f32 1.0, %v3279_v60 }
0x1807   :  { %3280 = vrcp.f32 %v1205_v61 }
0x1814   :  { %v3281_v62 = vpop.eup %3280 }
0x1815   :  { %v1209_v1 = vmul.f32 %v3281_v62, %v1116_v49  ;;  %v1437_v49 = vld [vmem:[#allocation2 + $0xb] sm:$0x1] }
0x1875   :  { %v1212_v63 = vpop.permute.xlu0 %1211 }
0x1876   :  { %v1214_v0 = vmul.f32 %v3281_v62, %v1212_v63 }
0x1878   :  { %1216 = vrot.lane.b32.xlu1 %v1214_v0, %s3402_s26 }
0x18ea   :  { %v1217_v2 = vpop.permute.xlu1 %1216 }
0x18eb   :  { %v1219_v3 = vadd.f32 %v1217_v2, %v1209_v1 }
0x18ed   :  { %3282 = vtanh.f32 %v1219_v3 }
0x18fa   :  { %v3283_v4 = vpop.eup %3282 }
0x18fb   :  { %1222 = vrot.lane.b32.xlu0 %v3283_v4, %s3401_s2 }
0x196d   :  { %v1223_v5 = vpop.permute.xlu0 %1222 }
0x196e   :  { %v1225_v6 = vmul.f32 %v3281_v62, %v1223_v5 }
0x1970   :  { %1227 = vrot.lane.b32.xlu1 %v1225_v6, %s3402_s26 }
0x19e2   :  { %v1228_v7 = vpop.permute.xlu1 %1227 }
0x19e3   :  { %1230 = vst.msk [vmem:[#allocation3 + $0x8] sm:$0x1] %vm405_vm4, %v1228_v7  ;;  %3069 = vmatmul.mubr.msk.f32.vlgmr.msra.gmra.mxu0 %vm214_vm3, %v1228_v7 }
0x19e4   :  { %3083 = vmatpush3.msra.mxu0 %v3444_v11  ;;  %3090 = vmatprep.mubr.msk.f32.mxu0 %vm3400_vm2, %v3399_v12 }
0x19e5   :  { %3084 = vmatprep.subr.mxu0 %v3399_v12 }
0x19e6   :  { %3085 = vmatpush3.msra.mxu0 %v3447_v13 }
0x19e7   :  { %3086 = vmatprep.subr.mxu0 %v3399_v12 }
0x19e8   :  { %3087 = vmatpush3.msra.mxu0 %v3454_v14 }
0x19e9   :  { %3088 = vmatprep.subr.mxu0 %v3399_v12 }
0x19ea   :  { %3089 = vmatpush3.msra.mxu0 %v3458_v15 }
0x19eb   :  { %3104 = vmatprep.subr.mxu0 %v3399_v12 }
0x1aa3   :  { %v1300_v9 = vpop.f32.mrf.mxu0 }
0x1aa4   :  { %v1304_v10 = vadd.f32 %v1300_v9, %v1231_v8 }
0x1aa5   :  { %v3070_v16 = vpop.f32.mrf.mxu0 }
0x1aa6   :  { %3284 = vtanh.f32 %v1304_v10  ;;  %v2769_v18 = vmul.f32 -1.442695, %v1304_v10 }
0x1aa8   :  { %3286 = vpow2.f32 %v2769_v18 }
0x1ab3   :  { %v3285_v17 = vpop.eup %3284 }
0x1ab4   :  { %1314 = vrot.lane.b32.xlu0 %v3285_v17, %s3401_s2 }
0x1ab5   :  { %v3287_v19 = vpop.eup %3286 }
0x1ab6   :  { %v1308_v20 = vadd.f32 1.0, %v3287_v19 }
0x1ab8   :  { %3288 = vrcp.f32 %v1308_v20 }
0x1ac5   :  { %v3289_v21 = vpop.eup %3288 }
0x1ac6   :  { %v1312_v24 = vmul.f32 %v3289_v21, %v1219_v3  ;;  %v1540_v3 = vld [vmem:[#allocation2 + $0xc] sm:$0x1] }
0x1b26   :  { %v1315_v22 = vpop.permute.xlu0 %1314 }
0x1b27   :  { %v1317_v23 = vmul.f32 %v3289_v21, %v1315_v22  ;;  %v3348_v22 = vld [vmem:[#allocation4 + $0x48] sm:$0xff] }
0x1b29   :  { %1319 = vrot.lane.b32.xlu1 %v1317_v23, %s3402_s26  ;;  %v3349_v23 = vld [vmem:[#allocation4 + $0x40] sm:$0xff] }
0x1b9b   :  { %v1320_v25 = vpop.permute.xlu1 %1319 }
0x1b9c   :  { %v1322_v26 = vadd.f32 %v1320_v25, %v1312_v24  ;;  %v3350_v24 = vld [vmem:[#allocation4 + $0x38] sm:$0xff]  ;;  %v3351_v25 = vld [vmem:[#allocation4 + $0x30] sm:$0xff] }
0x1b9e   :  { %3290 = vtanh.f32 %v1322_v26 }
0x1bab   :  { %v3291_v27 = vpop.eup %3290 }
0x1bac   :  { %1325 = vrot.lane.b32.xlu0 %v3291_v27, %s3401_s2 }
0x1c1e   :  { %v1326_v28 = vpop.permute.xlu0 %1325 }
0x1c1f   :  { %v1328_v29 = vmul.f32 %v3289_v21, %v1326_v28 }
0x1c21   :  { %1330 = vrot.lane.b32.xlu1 %v1328_v29, %s3402_s26 }
0x1c93   :  { %v1331_v30 = vpop.permute.xlu1 %1330 }
0x1c94   :  { %1333 = vst.msk [vmem:[#allocation3 + $0x9] sm:$0x1] %vm405_vm4, %v1331_v30  ;;  %3080 = vmatmul.mubr.msk.f32.vlgmr.msra.gmra.mxu1 %vm214_vm3, %v1331_v30 }
0x1c95   :  { %3094 = vmatpush3.msra.mxu1 %v3444_v11  ;;  %3101 = vmatprep.mubr.msk.f32.mxu1 %vm3400_vm2, %v3399_v12 }
0x1c96   :  { %3095 = vmatprep.subr.mxu1 %v3399_v12 }
0x1c97   :  { %3096 = vmatpush3.msra.mxu1 %v3447_v13 }
0x1c98   :  { %3097 = vmatprep.subr.mxu1 %v3399_v12 }
0x1c99   :  { %3098 = vmatpush3.msra.mxu1 %v3454_v14 }
0x1c9a   :  { %3099 = vmatprep.subr.mxu1 %v3399_v12 }
0x1c9b   :  { %3100 = vmatpush3.msra.mxu1 %v3458_v15 }
0x1c9c   :  { %3115 = vmatprep.subr.mxu1 %v3399_v12 }
0x1d54   :  { %v1403_v32 = vpop.f32.mrf.mxu1 }
0x1d55   :  { %v1407_v33 = vadd.f32 %v1403_v32, %v1334_v31 }
0x1d56   :  { %v3081_v34 = vpop.f32.mrf.mxu1 }
0x1d57   :  { %3292 = vtanh.f32 %v1407_v33  ;;  %v2771_v36 = vmul.f32 -1.442695, %v1407_v33 }
0x1d59   :  { %3294 = vpow2.f32 %v2771_v36 }
0x1d64   :  { %v3293_v35 = vpop.eup %3292 }
0x1d65   :  { %1417 = vrot.lane.b32.xlu0 %v3293_v35, %s3401_s2 }
0x1d66   :  { %v3295_v37 = vpop.eup %3294 }
0x1d67   :  { %v1411_v38 = vadd.f32 1.0, %v3295_v37 }
0x1d69   :  { %3296 = vrcp.f32 %v1411_v38 }
0x1d76   :  { %v3297_v39 = vpop.eup %3296 }
0x1d77   :  { %v1415_v42 = vmul.f32 %v3297_v39, %v1322_v26  ;;  %v1643_v26 = vld [vmem:[#allocation2 + $0xd] sm:$0x1] }
0x1dd7   :  { %v1418_v40 = vpop.permute.xlu0 %1417 }
0x1dd8   :  { %v1420_v41 = vmul.f32 %v3297_v39, %v1418_v40 }
0x1dda   :  { %1422 = vrot.lane.b32.xlu1 %v1420_v41, %s3402_s26 }
0x1e4c   :  { %v1423_v43 = vpop.permute.xlu1 %1422 }
0x1e4d   :  { %v1425_v44 = vadd.f32 %v1423_v43, %v1415_v42  ;;  %v1952_v43 = vld [vmem:[#allocation3] sm:$0xff] }
0x1e4f   :  { %3298 = vtanh.f32 %v1425_v44 }
0x1e5c   :  { %v3299_v45 = vpop.eup %3298 }
0x1e5d   :  { %1428 = vrot.lane.b32.xlu0 %v3299_v45, %s3401_s2 }
0x1ecf   :  { %v1429_v46 = vpop.permute.xlu0 %1428 }
0x1ed0   :  { %v1431_v47 = vmul.f32 %v3297_v39, %v1429_v46 }
0x1ed2   :  { %1433 = vrot.lane.b32.xlu1 %v1431_v47, %s3402_s26 }
0x1f44   :  { %v1434_v48 = vpop.permute.xlu1 %1433 }
0x1f45   :  { %1436 = vst.msk [vmem:[#allocation3 + $0xa] sm:$0x1] %vm405_vm4, %v1434_v48  ;;  %3091 = vmatmul.mubr.msk.f32.vlgmr.msra.gmra.mxu0 %vm214_vm3, %v1434_v48 }
0x1f46   :  { %3105 = vmatpush3.msra.mxu0 %v3444_v11  ;;  %3112 = vmatprep.mubr.msk.f32.mxu0 %vm3400_vm2, %v3399_v12 }
0x1f47   :  { %3106 = vmatprep.subr.mxu0 %v3399_v12 }
0x1f48   :  { %3107 = vmatpush3.msra.mxu0 %v3447_v13 }
0x1f49   :  { %3108 = vmatprep.subr.mxu0 %v3399_v12 }
0x1f4a   :  { %3109 = vmatpush3.msra.mxu0 %v3454_v14 }
0x1f4b   :  { %3110 = vmatprep.subr.mxu0 %v3399_v12 }
0x1f4c   :  { %3111 = vmatpush3.msra.mxu0 %v3458_v15 }
0x1f4d   :  { %3126 = vmatprep.subr.mxu0 %v3399_v12 }
0x2005   :  { %v1506_v50 = vpop.f32.mrf.mxu0 }
0x2006   :  { %v1510_v51 = vadd.f32 %v1506_v50, %v1437_v49 }
0x2007   :  { %v3092_v52 = vpop.f32.mrf.mxu0 }
0x2008   :  { %3300 = vtanh.f32 %v1510_v51  ;;  %v2773_v54 = vmul.f32 -1.442695, %v1510_v51 }
0x200a   :  { %3302 = vpow2.f32 %v2773_v54 }
0x2015   :  { %v3301_v53 = vpop.eup %3300 }
0x2016   :  { %1520 = vrot.lane.b32.xlu0 %v3301_v53, %s3401_s2 }
0x2017   :  { %v3303_v55 = vpop.eup %3302 }
0x2018   :  { %v1514_v56 = vadd.f32 1.0, %v3303_v55 }
0x201a   :  { %3304 = vrcp.f32 %v1514_v56 }
0x2027   :  { %v3305_v57 = vpop.eup %3304 }
0x2028   :  { %v1518_v60 = vmul.f32 %v3305_v57, %v1425_v44  ;;  %v1746_v44 = vld [vmem:[#allocation2 + $0xe] sm:$0x1] }
0x2088   :  { %v1521_v58 = vpop.permute.xlu0 %1520 }
0x2089   :  { %v1523_v59 = vmul.f32 %v3305_v57, %v1521_v58 }
0x208b   :  { %1525 = vrot.lane.b32.xlu1 %v1523_v59, %s3402_s26 }
0x20fd   :  { %v1526_v61 = vpop.permute.xlu1 %1525 }
0x20fe   :  { %v1528_v62 = vadd.f32 %v1526_v61, %v1518_v60 }
0x2100   :  { %3306 = vtanh.f32 %v1528_v62 }
0x210d   :  { %v3307_v63 = vpop.eup %3306 }
0x210e   :  { %1531 = vrot.lane.b32.xlu0 %v3307_v63, %s3401_s2 }
0x2180   :  { %v1532_v0 = vpop.permute.xlu0 %1531 }
0x2181   :  { %v1534_v1 = vmul.f32 %v3305_v57, %v1532_v0 }
0x2183   :  { %1536 = vrot.lane.b32.xlu1 %v1534_v1, %s3402_s26 }
0x21f5   :  { %v1537_v2 = vpop.permute.xlu1 %1536 }
0x21f6   :  { %1539 = vst.msk [vmem:[#allocation3 + $0xb] sm:$0x1] %vm405_vm4, %v1537_v2  ;;  %3102 = vmatmul.mubr.msk.f32.vlgmr.msra.gmra.mxu1 %vm214_vm3, %v1537_v2 }
0x21f7   :  { %3116 = vmatpush3.msra.mxu1 %v3444_v11  ;;  %3123 = vmatprep.mubr.msk.f32.mxu1 %vm3400_vm2, %v3399_v12 }
0x21f8   :  { %3117 = vmatprep.subr.mxu1 %v3399_v12 }
0x21f9   :  { %3118 = vmatpush3.msra.mxu1 %v3447_v13 }
0x21fa   :  { %3119 = vmatprep.subr.mxu1 %v3399_v12 }
0x21fb   :  { %3120 = vmatpush3.msra.mxu1 %v3454_v14 }
0x21fc   :  { %3121 = vmatprep.subr.mxu1 %v3399_v12 }
0x21fd   :  { %3122 = vmatpush3.msra.mxu1 %v3458_v15 }
0x22b6   :  { %v1609_v4 = vpop.f32.mrf.mxu1 }
0x22b7   :  { %v1613_v5 = vadd.f32 %v1609_v4, %v1540_v3 }
0x22b8   :  { %v3103_v6 = vpop.f32.mrf.mxu1 }
0x22b9   :  { %3308 = vtanh.f32 %v1613_v5  ;;  %v2775_v7 = vmul.f32 -1.442695, %v1613_v5 }
0x22bb   :  { %3310 = vpow2.f32 %v2775_v7 }
0x22c6   :  { %v3309_v11 = vpop.eup %3308 }
0x22c7   :  { %1623 = vrot.lane.b32.xlu0 %v3309_v11, %s3401_s2 }
0x22c8   :  { %v3311_v8 = vpop.eup %3310 }
0x22c9   :  { %v1617_v13 = vadd.f32 1.0, %v3311_v8 }
0x22cb   :  { %3312 = vrcp.f32 %v1617_v13 }
0x22d8   :  { %v3313_v9 = vpop.eup %3312 }
0x22d9   :  { %v1621_v16 = vmul.f32 %v3313_v9, %v1528_v62  ;;  %v1849_v62 = vld [vmem:[#allocation2 + $0xf] sm:$0x1] }
0x2339   :  { %v1624_v10 = vpop.permute.xlu0 %1623 }
0x233a   :  { %v1626_v14 = vmul.f32 %v3313_v9, %v1624_v10 }
0x233c   :  { %1628 = vrot.lane.b32.xlu1 %v1626_v14, %s3402_s26  ;;  %v1957_v14 = vld [vmem:[#allocation4 + $0x70] sm:$0xff] }
0x233d   :  { %3137 = vmatprep.subr.mxu1 %v1957_v14 }
0x23ae   :  { %v1629_v15 = vpop.permute.xlu1 %1628 }
0x23af   :  { %v1631_v17 = vadd.f32 %v1629_v15, %v1621_v16  ;;  %v1956_v16 = vld [vmem:[#allocation4 + $0x68] sm:$0xff]  ;;  %v1955_v15 = vld [vmem:[#allocation4 + $0x60] sm:$0xff] }
0x23b1   :  { %3314 = vtanh.f32 %v1631_v17 }
0x23be   :  { %v3315_v18 = vpop.eup %3314 }
0x23bf   :  { %1634 = vrot.lane.b32.xlu0 %v3315_v18, %s3401_s2 }
0x2431   :  { %v1635_v19 = vpop.permute.xlu0 %1634 }
0x2432   :  { %v1637_v20 = vmul.f32 %v3313_v9, %v1635_v19 }
0x2434   :  { %1639 = vrot.lane.b32.xlu1 %v1637_v20, %s3402_s26 }
0x24a6   :  { %v1640_v21 = vpop.permute.xlu1 %1639 }
0x24a7   :  { %1642 = vst.msk [vmem:[#allocation3 + $0xc] sm:$0x1] %vm405_vm4, %v1640_v21  ;;  %3113 = vmatmul.mubr.msk.f32.vlgmr.msra.gmra.mxu0 %vm214_vm3, %v1640_v21 }
0x24a8   :  { %3127 = vmatpush3.msra.mxu0 %v3348_v22  ;;  %3134 = vmatprep.mubr.msk.f32.mxu0 %vm3400_vm2, %v3399_v12  ;;  %v2039_v22 = vld [vmem:[%s3743_s1] sm:$0xff] }
0x24a9   :  { %3128 = vmatprep.subr.mxu0 %v3399_v12 }
0x24aa   :  { %3129 = vmatpush3.msra.mxu0 %v3349_v23 }
0x24ab   :  { %3130 = vmatprep.subr.mxu0 %v3399_v12 }
0x24ac   :  { %3131 = vmatpush3.msra.mxu0 %v3350_v24 }
0x24ad   :  { %3132 = vmatprep.subr.mxu0 %v3399_v12 }
0x24ae   :  { %3133 = vmatpush3.msra.mxu0 %v3351_v25  ;;  %v3715_v25 = vld [vmem:[%s3743_s1 + $0x8] sm:$0xff]  ;;  %s3403_s1 = smov [#allocation7]  }
0x24af   :  { %s2731_s4 = sshll.u32 %s3403_s1, 4  ;;  %s2732_s4 = int_to_ptr.vmem [resolvable:$true] %s2731_s4 }
0x24b0   :  { %s3372_s5 = scalar_lea.vmem %s2732_s4, 256  ;;  %p3377_p6 = scmp.lt.s32.totalorder %s2732_s4, %s2732_s4 }
0x24b1   :  { %p3373_p5 = scmp.ne.s32.totalorder %s2732_s4, %s3372_s5  ;;  %p3378_p7 = scmp.lt.s32.totalorder %s3372_s5, %s3372_s5 }
0x24b3   :  { %p3379_p8 = por %p3378_p7, %p3377_p6 }
0x24b5   :  { %p3380_p9 = pnand %p3379_p8, %p3373_p5 }
0x2567   :  { %v1712_v27 = vpop.f32.mrf.mxu0 }
0x2568   :  { %v1716_v28 = vadd.f32 %v1712_v27, %v1643_v26  ;;  %v2130_v26 = vld [vmem:[#allocation4 + $0x88] sm:$0xff]  ;;  %v2129_v27 = vld [vmem:[#allocation4 + $0x80] sm:$0xff] }
0x2569   :  { %v3114_v29 = vpop.f32.mrf.mxu0 }
0x256a   :  { %3316 = vtanh.f32 %v1716_v28  ;;  %v2777_v31 = vmul.f32 -1.442695, %v1716_v28  ;;  %v2784_v28 = vld [vmem:[#allocation4 + $0x78] ss:$0 sm:$0xff] }
0x256c   :  { %3318 = vpow2.f32 %v2777_v31 }
0x2577   :  { %v3317_v30 = vpop.eup %3316 }
0x2578   :  { %1726 = vrot.lane.b32.xlu0 %v3317_v30, %s3401_s2 }
0x2579   :  { %v3319_v32 = vpop.eup %3318 }
0x257a   :  { %v1720_v33 = vadd.f32 1.0, %v3319_v32 }
0x257c   :  { %3320 = vrcp.f32 %v1720_v33 }
0x2589   :  { %v3321_v34 = vpop.eup %3320 }
0x258a   :  { %v1724_v12 = vmul.f32 %v3321_v34, %v1631_v17  ;;  %v1954_v17 = vld [vmem:[#allocation4 + $0x58] sm:$0xff] }
0x25ea   :  { %v1727_v35 = vpop.permute.xlu0 %1726 }
0x25eb   :  { %v1729_v36 = vmul.f32 %v3321_v34, %v1727_v35 }
0x25ed   :  { %1731 = vrot.lane.b32.xlu1 %v1729_v36, %s3402_s26 }
0x265f   :  { %v1732_v37 = vpop.permute.xlu1 %1731 }
0x2660   :  { %v1734_v38 = vadd.f32 %v1732_v37, %v1724_v12  ;;  %v2295_v12 = vld [vmem:[#allocation4 + $0xa0] sm:$0xff]  ;;  %v2294_v37 = vld [vmem:[#allocation4 + $0x98] sm:$0xff] }
0x2662   :  { %3322 = vtanh.f32 %v1734_v38 }
0x266f   :  { %v3323_v39 = vpop.eup %3322 }
0x2670   :  { %1737 = vrot.lane.b32.xlu0 %v3323_v39, %s3401_s2 }
0x26e2   :  { %v1738_v40 = vpop.permute.xlu0 %1737 }
0x26e3   :  { %v1740_v41 = vmul.f32 %v3321_v34, %v1738_v40 }
0x26e5   :  { %1742 = vrot.lane.b32.xlu1 %v1740_v41, %s3402_s26 }
0x2757   :  { %v1743_v42 = vpop.permute.xlu1 %1742 }
0x2758   :  { %1745 = vst.msk [vmem:[#allocation3 + $0xd] sm:$0x1] %vm405_vm4, %v1743_v42  ;;  %3124 = vmatmul.mubr.msk.f32.vlgmr.msra.gmra.mxu1 %vm214_vm3, %v1743_v42 }
0x2759   :  { %3145 = vmatprep.mubr.msk.f32.mxu1 %vm214_vm3, %v1952_v43  ;;  %3138 = vmatpush3.msra.mxu1 %v1957_v14 }
0x275a   :  { %3139 = vmatprep.subr.mxu1 %v1956_v16 }
0x275b   :  { %3140 = vmatpush3.msra.mxu1 %v1956_v16 }
0x275c   :  { %3141 = vmatprep.subr.mxu1 %v1955_v15 }
0x275d   :  { %3142 = vmatpush3.msra.mxu1 %v1955_v15 }
0x275e   :  { %3143 = vmatprep.subr.mxu1 %v1954_v17 }
0x275f   :  { %3144 = vmatpush3.msra.mxu1 %v1954_v17 }
0x2760   :  { %3155 = vmatprep.subr.mxu1 %v2130_v26 }
0x2818   :  { %v1815_v45 = vpop.f32.mrf.mxu1 }
0x2819   :  { %v1819_v46 = vadd.f32 %v1815_v45, %v1746_v44 }
0x281a   :  { %v3125_v47 = vpop.f32.mrf.mxu1 }
0x281b   :  { %3324 = vtanh.f32 %v1819_v46  ;;  %v2779_v49 = vmul.f32 -1.442695, %v1819_v46  ;;  %v2460_v47 = vld [vmem:[#allocation4 + $0xb8] sm:$0xff] }
0x281d   :  { %3326 = vpow2.f32 %v2779_v49  ;;  %v2794_v49 = vld [vmem:[#allocation4 + $0xa8] ss:$0 sm:$0xff] }
0x2828   :  { %v3325_v48 = vpop.eup %3324 }
0x2829   :  { %1829 = vrot.lane.b32.xlu0 %v3325_v48, %s3401_s2  ;;  %v2459_v48 = vld [vmem:[#allocation4 + $0xb0] sm:$0xff] }
0x282a   :  { %v3327_v50 = vpop.eup %3326 }
0x282b   :  { %v1823_v51 = vadd.f32 1.0, %v3327_v50 }
0x282d   :  { %3328 = vrcp.f32 %v1823_v51 }
0x283a   :  { %v3329_v52 = vpop.eup %3328 }
0x283b   :  { %v1827_v55 = vmul.f32 %v3329_v52, %v1734_v38  ;;  %v2789_v38 = vld [vmem:[#allocation4 + $0x90] ss:$0 sm:$0xff] }
0x289b   :  { %v1830_v53 = vpop.permute.xlu0 %1829 }
0x289c   :  { %v1832_v54 = vmul.f32 %v3329_v52, %v1830_v53 }
0x289e   :  { %1834 = vrot.lane.b32.xlu1 %v1832_v54, %s3402_s26 }
0x2910   :  { %v1835_v56 = vpop.permute.xlu1 %1834 }
0x2911   :  { %v1837_v57 = vadd.f32 %v1835_v56, %v1827_v55 }
0x2913   :  { %3330 = vtanh.f32 %v1837_v57 }
0x2920   :  { %v3331_v58 = vpop.eup %3330 }
0x2921   :  { %1840 = vrot.lane.b32.xlu0 %v3331_v58, %s3401_s2  ;;  %v2625_v58 = vld [vmem:[#allocation4 + $0xd0] sm:$0xff] }
0x2993   :  { %v1841_v59 = vpop.permute.xlu0 %1840 }
0x2994   :  { %v1843_v60 = vmul.f32 %v3329_v52, %v1841_v59  ;;  %v2624_v59 = vld [vmem:[#allocation4 + $0xc8] sm:$0xff] }
0x2996   :  { %1845 = vrot.lane.b32.xlu1 %v1843_v60, %s3402_s26  ;;  %v2799_v60 = vld [vmem:[#allocation4 + $0xc0] ss:$0 sm:$0xff] }
0x2a08   :  { %v1846_v61 = vpop.permute.xlu1 %1845 }
0x2a09   :  { %1848 = vst.msk [vmem:[#allocation3 + $0xe] sm:$0x1] %vm405_vm4, %v1846_v61  ;;  %3135 = vmatmul.mubr.msk.f32.vlgmr.msra.gmra.mxu0 %vm214_vm3, %v1846_v61 }
0x2a0a   :  { %3152 = vmatprep.mubr.msk.f32.mxu0 %vm121_vm1, %v2039_v22 }
0x2ac9   :  { %v1918_v63 = vpop.f32.mrf.mxu0 }
0x2aca   :  { %v1922_v0 = vadd.f32 %v1918_v63, %v1849_v62 }
0x2acb   :  { %v3136_v1 = vpop.f32.mrf.mxu0 }
0x2acc   :  { %3332 = vtanh.f32 %v1922_v0  ;;  %v2781_v3 = vmul.f32 -1.442695, %v1922_v0 }
0x2ace   :  { %3334 = vpow2.f32 %v2781_v3  ;;  %v2802_v3 = vld [vmem:[#allocation4 + $0xd8] ss:$0 sm:$0xff] }
0x2ad9   :  { %v3333_v2 = vpop.eup %3332 }
0x2ada   :  { %1932 = vrot.lane.b32.xlu0 %v3333_v2, %s3401_s2 }
0x2adb   :  { %v3335_v4 = vpop.eup %3334 }
0x2adc   :  { %v1926_v5 = vadd.f32 1.0, %v3335_v4 }
0x2ade   :  { %3336 = vrcp.f32 %v1926_v5 }
0x2aeb   :  { %v3337_v6 = vpop.eup %3336 }
0x2aec   :  { %v1930_v8 = vmul.f32 %v3337_v6, %v1837_v57 }
0x2b4c   :  { %v1933_v11 = vpop.permute.xlu0 %1932 }
0x2b4d   :  { %v1935_v7 = vmul.f32 %v3337_v6, %v1933_v11 }
0x2b4f   :  { %1937 = vrot.lane.b32.xlu1 %v1935_v7, %s3402_s26 }
0x2bc1   :  { %v1938_v13 = vpop.permute.xlu1 %1937 }
0x2bc2   :  { %v1940_v9 = vadd.f32 %v1938_v13, %v1930_v8 }
0x2bc4   :  { %3338 = vtanh.f32 %v1940_v9 }
0x2bd1   :  { %v3339_v10 = vpop.eup %3338 }
0x2bd2   :  { %1943 = vrot.lane.b32.xlu0 %v3339_v10, %s3401_s2 }
0x2c44   :  { %v1944_v18 = vpop.permute.xlu0 %1943 }
0x2c45   :  { %v1946_v19 = vmul.f32 %v3337_v6, %v1944_v18 }
0x2c47   :  { %1948 = vrot.lane.b32.xlu1 %v1946_v19, %s3402_s26 }
0x2cb9   :  { %v1949_v20 = vpop.permute.xlu1 %1948 }
0x2cba   :  { %1951 = vst.msk [vmem:[#allocation3 + $0xf] sm:$0x1] %vm405_vm4, %v1949_v20 }
0x2cc1   :  { %v1953_v21 = vld [vmem:[#allocation3 + $0x8] sm:$0xff] }
0x2cc2   :  { %3146 = vmatmul.mubr.msk.f32.vlgmr.msra.gmra.mxu1 %vm214_vm3, %v1953_v21 }
0x2cc3   :  { %3156 = vmatpush3.msra.mxu1 %v2130_v26 }
0x2cc4   :  { %3157 = vmatprep.subr.mxu1 %v2129_v27 }
0x2cc5   :  { %3158 = vmatpush3.msra.mxu1 %v2129_v27 }
0x2cc6   :  { %3169 = vmatprep.subr.mxu1 %v2295_v12 }
0x2d82   :  { %v3147_v23 = vpop.f32.mrf.mxu1 }
0x2d83   :  { %3148 = vmatprep.subr.mxu0 %v3147_v23 }
0x2d84   :  { %v2030_v24 = vpop.f32.mrf.mxu1  ;;  %3149 = vmatpush3.msra.mxu0 %v3147_v23 }
0x2d85   :  { %3150 = vmatprep.subr.mxu0 %v2030_v24 }
0x2d86   :  { %3151 = vmatpush3.msra.mxu0 %v2030_v24 }
0x2d87   :  { %3153 = vmatmul.mubr.msk.f32.vlgmr.msra.gmra.mxu0 %vm121_vm1, %v3715_v25 }
0x2d88   :  { %3166 = vmatprep.mubr.msk.f32.mxu0 %vm121_vm1, %v2039_v22 }
0x2e47   :  { %v3154_v29 = vpop.f32.mrf.mxu0 }
0x2e48   :  { %v2124_v30 = vadd.f32 %v3154_v29, %v2784_v28 }
0x2e49   :  { %v2118_v31 = vpop.f32.mrf.mxu0 }
0x2e4a   :  { %v2119_v32 = vadd.f32 %v2784_v28, %v2118_v31  ;;  %v2128_v34 = vmax.f32 %v2124_v30, 0.0 }
0x2e4c   :  { %v2127_v33 = vmax.f32 %v2119_v32, 0.0 }
0x2e4e   :  { %3159 = vmatprep.mubr.msk.f32.mxu1 %vm121_vm1, %v2127_v33 }
0x2e4f   :  { %3160 = vmatmul.mubr.msk.f32.vlgmr.msra.gmra.mxu1 %vm121_vm1, %v2128_v34 }
0x2e50   :  { %3170 = vmatpush3.msra.mxu1 %v2295_v12 }
0x2e51   :  { %3171 = vmatprep.subr.mxu1 %v2294_v37 }
0x2e52   :  { %3172 = vmatpush3.msra.mxu1 %v2294_v37 }
0x2e53   :  { %3183 = vmatprep.subr.mxu1 %v2460_v47 }
0x2f0f   :  { %v3161_v35 = vpop.f32.mrf.mxu1 }
0x2f10   :  { %3162 = vmatprep.subr.mxu0 %v3161_v35 }
0x2f11   :  { %v2203_v36 = vpop.f32.mrf.mxu1  ;;  %3163 = vmatpush3.msra.mxu0 %v3161_v35 }
0x2f12   :  { %3164 = vmatprep.subr.mxu0 %v2203_v36 }
0x2f13   :  { %3165 = vmatpush3.msra.mxu0 %v2203_v36 }
0x2f14   :  { %3167 = vmatmul.mubr.msk.f32.vlgmr.msra.gmra.mxu0 %vm121_vm1, %v3715_v25 }
0x2f15   :  { %3180 = vmatprep.mubr.msk.f32.mxu0 %vm121_vm1, %v2039_v22 }
0x2fd4   :  { %v3168_v39 = vpop.f32.mrf.mxu0 }
0x2fd5   :  { %v2289_v40 = vadd.f32 %v3168_v39, %v2789_v38 }
0x2fd6   :  { %v2283_v41 = vpop.f32.mrf.mxu0 }
0x2fd7   :  { %v2284_v42 = vadd.f32 %v2789_v38, %v2283_v41  ;;  %v2293_v44 = vmax.f32 %v2289_v40, 0.0 }
0x2fd9   :  { %v2292_v43 = vmax.f32 %v2284_v42, 0.0 }
0x2fdb   :  { %3173 = vmatprep.mubr.msk.f32.mxu1 %vm121_vm1, %v2292_v43 }
0x2fdc   :  { %3174 = vmatmul.mubr.msk.f32.vlgmr.msra.gmra.mxu1 %vm121_vm1, %v2293_v44 }
0x2fdd   :  { %3184 = vmatpush3.msra.mxu1 %v2460_v47 }
0x2fde   :  { %3185 = vmatprep.subr.mxu1 %v2459_v48 }
0x2fdf   :  { %3186 = vmatpush3.msra.mxu1 %v2459_v48 }
0x2fe0   :  { %3197 = vmatprep.subr.mxu1 %v2625_v58 }
0x309c   :  { %v3175_v45 = vpop.f32.mrf.mxu1 }
0x309d   :  { %3176 = vmatprep.subr.mxu0 %v3175_v45 }
0x309e   :  { %v2368_v46 = vpop.f32.mrf.mxu1  ;;  %3177 = vmatpush3.msra.mxu0 %v3175_v45 }
0x309f   :  { %3178 = vmatprep.subr.mxu0 %v2368_v46 }
0x30a0   :  { %3179 = vmatpush3.msra.mxu0 %v2368_v46 }
0x30a1   :  { %3181 = vmatmul.mubr.msk.f32.vlgmr.msra.gmra.mxu0 %vm121_vm1, %v3715_v25 }
0x30a2   :  { %3194 = vmatprep.mubr.msk.f32.mxu0 %vm121_vm1, %v2039_v22 }
0x3161   :  { %v3182_v50 = vpop.f32.mrf.mxu0 }
0x3162   :  { %v2454_v51 = vadd.f32 %v3182_v50, %v2794_v49 }
0x3163   :  { %v2448_v52 = vpop.f32.mrf.mxu0 }
0x3164   :  { %v2449_v53 = vadd.f32 %v2794_v49, %v2448_v52  ;;  %v2458_v55 = vmax.f32 %v2454_v51, 0.0 }
0x3166   :  { %v2457_v54 = vmax.f32 %v2449_v53, 0.0 }
0x3168   :  { %3187 = vmatprep.mubr.msk.f32.mxu1 %vm121_vm1, %v2457_v54 }
0x3169   :  { %3188 = vmatmul.mubr.msk.f32.vlgmr.msra.gmra.mxu1 %vm121_vm1, %v2458_v55 }
0x316a   :  { %3198 = vmatpush3.msra.mxu1 %v2625_v58 }
0x316b   :  { %3199 = vmatprep.subr.mxu1 %v2624_v59 }
0x316c   :  { %3200 = vmatpush3.msra.mxu1 %v2624_v59 }
0x3229   :  { %v3189_v56 = vpop.f32.mrf.mxu1 }
0x322a   :  { %3190 = vmatprep.subr.mxu0 %v3189_v56 }
0x322b   :  { %v2533_v57 = vpop.f32.mrf.mxu1  ;;  %3191 = vmatpush3.msra.mxu0 %v3189_v56 }
0x322c   :  { %3192 = vmatprep.subr.mxu0 %v2533_v57 }
0x322d   :  { %3193 = vmatpush3.msra.mxu0 %v2533_v57 }
0x322e   :  { %3195 = vmatmul.mubr.msk.f32.vlgmr.msra.gmra.mxu0 %vm121_vm1, %v3715_v25 }
0x32ee   :  { %v3196_v61 = vpop.f32.mrf.mxu0 }
0x32ef   :  { %v2619_v62 = vadd.f32 %v3196_v61, %v2799_v60 }
0x32f0   :  { %v2613_v63 = vpop.f32.mrf.mxu0 }
0x32f1   :  { %v2614_v0 = vadd.f32 %v2799_v60, %v2613_v63  ;;  %v2623_v2 = vmax.f32 %v2619_v62, 0.0 }
0x32f3   :  { %v2622_v1 = vmax.f32 %v2614_v0, 0.0 }
0x32f5   :  { %3201 = vmatprep.mubr.msk.f32.mxu1 %vm121_vm1, %v2622_v1 }
0x32f6   :  { %3202 = vmatmul.mubr.msk.f32.vlgmr.msra.gmra.mxu1 %vm121_vm1, %v2623_v2 }
0x33b6   :  { %v3203_v4 = vpop.f32.mrf.mxu1 }
0x33b7   :  { %v2709_v5 = vadd.f32 %v3203_v4, %v2802_v3 }
0x33b8   :  { %v2703_v6 = vpop.f32.mrf.mxu1 }
0x33b9   :  { %v2806_v11 = vmul.f32 -1.442695, %v2709_v5  ;;  %v2704_v7 = vadd.f32 %v2802_v3, %v2703_v6 }
0x33bb   :  { %3340 = vpow2.f32 %v2806_v11  ;;  %v2805_v8 = vmul.f32 -1.442695, %v2704_v7 }
0x33bd   :  { %3342 = vpow2.f32 %v2805_v8 }
0x33c8   :  { %v3341_v13 = vpop.eup %3340 }
0x33c9   :  { %v2719_v9 = vadd.f32 1.0, %v3341_v13 }
0x33ca   :  { %v3343_v10 = vpop.eup %3342 }
0x33cb   :  { %3344 = vrcp.f32 %v2719_v9  ;;  %v2718_v14 = vadd.f32 1.0, %v3343_v10 }
0x33cd   :  { %3346 = vrcp.f32 %v2718_v14 }
0x33d8   :  { %v3345_v16 = vpop.eup %3344 }
0x33d9   :  { %2725 = vst [vmem:[#allocation7 + $0x8] sm:$0xff] %v3345_v16 }
0x33da   :  { %v3347_v15 = vpop.eup %3346 }
0x33db   :  { %2724 = vst [vmem:[#allocation7] sm:$0xff] %v3347_v15 }
0x33dc   :  { %3383 = shalt.err (!%p3380_p9)
}
0x33dd   :  { %2737 = dma.vmem_to_hbm [thread:$0]  %s2732_s4, 256, %s3745_s3, [#allocation6], %s3397_s15, %s3397_s15, %s3398_s16  }
0x33de   :  { %3394 = dma.done.wait [#allocation6], 256  }
0x33df   :  { %3395 = vsyncadd [#allocation6], 4294967040 }
0x33e0   :  { %2741 = vsyncpa [#allocation5], 1 }
0x33e1   :  { %2742 = vsyncpa [#allocation6], 1 }

</bundles_post_ra>
